<compile_context>
chip_gen: v5e
topology: v5e:2x2
jax: 0.10.0
libtpu: 0.0.40
codegen_flags: <defaults>
</compile_context>

<pallas_src>
import jax
import jax.numpy as jnp
from jax.experimental import pallas as pl
from jax.experimental.pallas import tpu as pltpu

EPS = 1e-5  # torch.nn.InstanceNorm2d default (affine=False, biased variance)


def _make_resblock_kernel(H, W, C, pad_left):
    HW = H * W

    def kernel(x_ref, w1_ref, w2_ref, o_ref, pad_ref):
        # x_ref  : (1, C, HW)                  current instance (channels on sublanes)
        # w*_ref : (3, 3, C, C)                conv weights as (ky, kx, cout, cin)
        # o_ref  : (1, C, HW)
        # pad_ref: (C, pad_left + HW + W + 1)  flat row-padded scratch
        x = x_ref[0].astype(jnp.float32)                       # (C, HW)

        # Column-edge masks: only taps with dx != 0 can wrap across row ends.
        col = jax.lax.broadcasted_iota(jnp.int32, (1, HW), 1) % W
        not_first_col = col != 0                               # for dx = -1 taps
        not_last_col = col != W - 1                            # for dx = +1 taps

        # Zero the halos once; the interior is overwritten before each conv.
        pad_ref[:, :pad_left] = jnp.zeros((C, pad_left), jnp.float32)
        pad_ref[:, pad_left + HW:] = jnp.zeros((C, W + 1), jnp.float32)

        def conv3x3(inp, w_ref):
            pad_ref[:, pad_left:pad_left + HW] = inp           # 128-aligned store
            acc = jnp.zeros((C, HW), jnp.float32)
            for dx in (-1, 0, 1):
                grp = jnp.zeros((C, HW), jnp.float32)
                for dy in (-1, 0, 1):
                    start = pad_left + dy * W + dx
                    win = pad_ref[:, start:start + HW]         # (C, HW) lane slice
                    grp = grp + jnp.dot(w_ref[dy + 1, dx + 1], win,
                                        preferred_element_type=jnp.float32)
                if dx == -1:
                    grp = jnp.where(not_first_col, grp, 0.0)
                elif dx == 1:
                    grp = jnp.where(not_last_col, grp, 0.0)
                acc = acc + grp
            return acc

        def instance_norm(y):
            # per-channel mean/var over the spatial (lane) axis of this instance
            mean = jnp.mean(y, axis=1, keepdims=True)               # (C, 1)
            var = jnp.mean((y - mean) ** 2, axis=1, keepdims=True)  # (C, 1)
            return (y - mean) * jax.lax.rsqrt(var + EPS)

        y = instance_norm(conv3x3(x, w1_ref))
        y = jnp.maximum(y, 0.0)                                 # ReLU
        y = instance_norm(conv3x3(y, w2_ref))

        o_ref[0] = (x + y).astype(o_ref.dtype)                  # residual add

    return kernel


def residual_block(x_nchw, w1, b1, w2, b2):
    """x_nchw: (N, C, H, W) f32; conv weights (C, C, 3, 3); biases (C,).

    The biases are accepted for API compatibility but not used: a conv bias is
    exactly cancelled by the affine-free InstanceNorm that follows each conv.
    """
    del b1, b2
    N, C, H, W = x_nchw.shape
    HW = H * W
    pad_left = ((W + 1 + 127) // 128) * 128        # 128-aligned interior offset
    pad_len = pad_left + HW + W + 1

    x2 = x_nchw.reshape(N, C, HW)                  # contiguous reshape, no copy
    w1t = jnp.transpose(w1, (2, 3, 0, 1))          # (ky, kx, cout, cin) - tiny
    w2t = jnp.transpose(w2, (2, 3, 0, 1))

    out = pl.pallas_call(
        _make_resblock_kernel(H, W, C, pad_left),
        out_shape=jax.ShapeDtypeStruct((N, C, HW), x_nchw.dtype),
        grid_spec=pltpu.PrefetchScalarGridSpec(
            num_scalar_prefetch=0,
            grid=(N,),
            in_specs=[
                pl.BlockSpec((1, C, HW), lambda n: (n, 0, 0)),
                pl.BlockSpec((3, 3, C, C), lambda n: (0, 0, 0, 0)),
                pl.BlockSpec((3, 3, C, C), lambda n: (0, 0, 0, 0)),
            ],
            out_specs=pl.BlockSpec((1, C, HW), lambda n: (n, 0, 0)),
            scratch_shapes=[pltpu.VMEM((C, pad_len), jnp.float32)],
        ),
        compiler_params=pltpu.CompilerParams(
            dimension_semantics=("parallel",),     # batch-parallel (2 TCs on v7x)
            vmem_limit_bytes=32 * 1024 * 1024,
        ),
    )(x2, w1t, w2t)

    return out.reshape(N, C, H, W)


def _reference(x_nchw, w1, b1, w2, b2):
    """Pure-JAX reference replicating the PyTorch module (biases included)."""
    def conv(x, w, b):
        y = jax.lax.conv_general_dilated(
            x, w, window_strides=(1, 1), padding=((1, 1), (1, 1)),
            dimension_numbers=("NCHW", "OIHW", "NCHW"))
        return y + b[None, :, None, None]

    def inorm(x):
        mean = jnp.mean(x, axis=(2, 3), keepdims=True)
        var = jnp.mean((x - mean) ** 2, axis=(2, 3), keepdims=True)
        return (x - mean) * jax.lax.rsqrt(var + EPS)

    y = conv(x_nchw, w1, b1)
    y = jnp.maximum(inorm(y), 0.0)
    y = inorm(conv(y, w2, b2))
    return x_nchw + y


if __name__ == "__main__":
    N, C, H, W = 2, 4, 16, 16
    key = jax.random.PRNGKey(0)
    kx, kw1, kb1, kw2, kb2 = jax.random.split(key, 5)

    x = jax.random.normal(kx, (N, C, H, W), jnp.float32)
    fan_in = C * 3 * 3
    w1 = jax.random.normal(kw1, (C, C, 3, 3), jnp.float32) / jnp.sqrt(fan_in)
    b1 = jax.random.normal(kb1, (C,), jnp.float32) * 0.01
    w2 = jax.random.normal(kw2, (C, C, 3, 3), jnp.float32) / jnp.sqrt(fan_in)
    b2 = jax.random.normal(kb2, (C,), jnp.float32) * 0.01

    out = residual_block(x, w1, b1, w2, b2)
    out = jax.block_until_ready(out)

    ref = _reference(x, w1, b1, w2, b2)
    assert out.shape == (N, C, H, W)
    assert jnp.max(jnp.abs(out - ref)) < 1e-2, "mismatch vs pure-JAX reference"

    print("KERNEL_OK")
</pallas_src>

<mosaic_0001>
module attributes {stable_mosaic.version = 11 : i64} {
  func.func @kernel(%arg0: i32, %arg1: memref<1x4x256xf32, #tpu.memory_space<vmem>>, %arg2: memref<3x3x4x4xf32, #tpu.memory_space<vmem>>, %arg3: memref<3x3x4x4xf32, #tpu.memory_space<vmem>>, %arg4: memref<1x4x256xf32, #tpu.memory_space<vmem>>, %arg5: memref<4x401xf32, #tpu.memory_space<vmem>>) attributes {dimension_semantics = [#tpu.dimension_semantics<parallel>], iteration_bounds = array<i64: 2>, scalar_prefetch = 0 : i64, scratch_operands = 1 : i64, tpu.core_type = #tpu.core_type<tc>, window_params = [{transform_indices = @transform_0, window_bounds = array<i64: 1, 4, 256>}, {pipeline_mode = #tpu.pipeline_mode<synchronous>, transform_indices = @transform_1, window_bounds = array<i64: 3, 3, 4, 4>}, {pipeline_mode = #tpu.pipeline_mode<synchronous>, transform_indices = @transform_2, window_bounds = array<i64: 3, 3, 4, 4>}, {transform_indices = @transform_3, window_bounds = array<i64: 1, 4, 256>}]} {
    %c0 = arith.constant 0 : index
    %c0_0 = arith.constant 0 : index
    %c0_1 = arith.constant 0 : index
    %0 = vector.load %arg1[%c0, %c0_0, %c0_1] : memref<1x4x256xf32, #tpu.memory_space<vmem>>, vector<1x4x256xf32>
    %1 = vector.shape_cast %0 : vector<1x4x256xf32> to vector<4x256xf32>
    %2 = tpu.iota {dimensions = array<i32: 1>} : vector<1x256xi32>
    %c16_i32 = arith.constant 16 : i32
    %c0_i32 = arith.constant 0 : i32
    %3 = arith.cmpi eq, %c16_i32, %c0_i32 : i32
    %c1_i32 = arith.constant 1 : i32
    %4 = arith.select %3, %c1_i32, %c16_i32 : i32
    %5 = vector.broadcast %4 : i32 to vector<1x256xi32>
    %6 = arith.remsi %2, %5 : vector<1x256xi32>
    %c0_i32_2 = arith.constant 0 : i32
    %7 = vector.broadcast %c0_i32_2 : i32 to vector<1x256xi32>
    %8 = arith.cmpi ne, %6, %7 : vector<1x256xi32>
    %c0_i32_3 = arith.constant 0 : i32
    %9 = vector.broadcast %c0_i32_3 : i32 to vector<1x256xi32>
    %10 = arith.cmpi slt, %6, %9 : vector<1x256xi32>
    %c0_i32_4 = arith.constant 0 : i32
    %11 = arith.cmpi slt, %4, %c0_i32_4 : i32
    %12 = vector.broadcast %11 : i1 to vector<1x256xi1>
    %13 = vector.broadcast %12 : vector<1x256xi1> to vector<1x256xi1>
    %14 = arith.xori %10, %13 : vector<1x256xi1>
    %15 = arith.andi %14, %8 : vector<1x256xi1>
    %16 = vector.broadcast %4 : i32 to vector<1x256xi32>
    %17 = arith.addi %6, %16 : vector<1x256xi32>
    %18 = arith.select %15, %17, %6 : vector<1x256xi1>, vector<1x256xi32>
    %c0_i32_5 = arith.constant 0 : i32
    %19 = vector.broadcast %c0_i32_5 : i32 to vector<1x256xi32>
    %20 = arith.cmpi ne, %18, %19 : vector<1x256xi32>
    %c15_i32 = arith.constant 15 : i32
    %21 = vector.broadcast %c15_i32 : i32 to vector<1x256xi32>
    %22 = arith.cmpi ne, %18, %21 : vector<1x256xi32>
    %cst = arith.constant 0.000000e+00 : f32
    %23 = vector.broadcast %cst : f32 to vector<4x128xf32>
    %c0_6 = arith.constant 0 : index
    %c0_7 = arith.constant 0 : index
    %24 = vector.load %arg5[%c0_6, %c0_7] : memref<4x401xf32, #tpu.memory_space<vmem>>, vector<4x128xf32>
    tpu.vector_store %arg5[%c0_6, %c0_7], %23 {strides = array<i32>} : memref<4x401xf32, #tpu.memory_space<vmem>>, vector<4x128xf32>,
    %cst_8 = arith.constant 0.000000e+00 : f32
    %25 = vector.broadcast %cst_8 : f32 to vector<4x17xf32>
    %c0_9 = arith.constant 0 : index
    %c384 = arith.constant 384 : index
    %26 = vector.load %arg5[%c0_9, %c384] : memref<4x401xf32, #tpu.memory_space<vmem>>, vector<4x17xf32>
    tpu.vector_store %arg5[%c0_9, %c384], %25 {strides = array<i32>} : memref<4x401xf32, #tpu.memory_space<vmem>>, vector<4x17xf32>,
    %c0_10 = arith.constant 0 : index
    %c128 = arith.constant 128 : index
    %27 = vector.load %arg5[%c0_10, %c128] : memref<4x401xf32, #tpu.memory_space<vmem>>, vector<4x256xf32>
    tpu.vector_store %arg5[%c0_10, %c128], %1 {strides = array<i32>} : memref<4x401xf32, #tpu.memory_space<vmem>>, vector<4x256xf32>,
    %cst_11 = arith.constant 0.000000e+00 : f32
    %28 = vector.broadcast %cst_11 : f32 to vector<4x256xf32>
    %cst_12 = arith.constant 0.000000e+00 : f32
    %29 = vector.broadcast %cst_12 : f32 to vector<4x256xf32>
    %c0_13 = arith.constant 0 : index
    %c111 = arith.constant 111 : index
    %30 = vector.load %arg5[%c0_13, %c111] : memref<4x401xf32, #tpu.memory_space<vmem>>, vector<4x256xf32>
    %c0_14 = arith.constant 0 : index
    %c0_15 = arith.constant 0 : index
    %c0_16 = arith.constant 0 : index
    %c0_17 = arith.constant 0 : index
    %31 = vector.load %arg2[%c0_14, %c0_15, %c0_16, %c0_17] : memref<3x3x4x4xf32, #tpu.memory_space<vmem>>, vector<1x1x4x4xf32>
    %32 = vector.shape_cast %31 : vector<1x1x4x4xf32> to vector<4x4xf32>
    %cst_18 = arith.constant dense<0.000000e+00> : vector<4x256xf32>
    %33 = tpu.matmul %32, %30, %cst_18 {dimension_numbers = #tpu.dot_dimension_numbers<[1], [0], [0], [1], [0, 0, 1, 1], [], []>} : vector<4x4xf32>, vector<4x256xf32>, vector<4x256xf32> -> vector<4x256xf32>
    %34 = arith.addf %29, %33 : vector<4x256xf32>
    %c0_19 = arith.constant 0 : index
    %c127 = arith.constant 127 : index
    %35 = vector.load %arg5[%c0_19, %c127] : memref<4x401xf32, #tpu.memory_space<vmem>>, vector<4x256xf32>
    %c1 = arith.constant 1 : index
    %c0_20 = arith.constant 0 : index
    %c0_21 = arith.constant 0 : index
    %c0_22 = arith.constant 0 : index
    %36 = vector.load %arg2[%c1, %c0_20, %c0_21, %c0_22] : memref<3x3x4x4xf32, #tpu.memory_space<vmem>>, vector<1x1x4x4xf32>
    %37 = vector.shape_cast %36 : vector<1x1x4x4xf32> to vector<4x4xf32>
    %cst_23 = arith.constant dense<0.000000e+00> : vector<4x256xf32>
    %38 = tpu.matmul %37, %35, %cst_23 {dimension_numbers = #tpu.dot_dimension_numbers<[1], [0], [0], [1], [0, 0, 1, 1], [], []>} : vector<4x4xf32>, vector<4x256xf32>, vector<4x256xf32> -> vector<4x256xf32>
    %39 = arith.addf %34, %38 : vector<4x256xf32>
    %c0_24 = arith.constant 0 : index
    %c143 = arith.constant 143 : index
    %40 = vector.load %arg5[%c0_24, %c143] : memref<4x401xf32, #tpu.memory_space<vmem>>, vector<4x256xf32>
    %c2 = arith.constant 2 : index
    %c0_25 = arith.constant 0 : index
    %c0_26 = arith.constant 0 : index
    %c0_27 = arith.constant 0 : index
    %41 = vector.load %arg2[%c2, %c0_25, %c0_26, %c0_27] : memref<3x3x4x4xf32, #tpu.memory_space<vmem>>, vector<1x1x4x4xf32>
    %42 = vector.shape_cast %41 : vector<1x1x4x4xf32> to vector<4x4xf32>
    %cst_28 = arith.constant dense<0.000000e+00> : vector<4x256xf32>
    %43 = tpu.matmul %42, %40, %cst_28 {dimension_numbers = #tpu.dot_dimension_numbers<[1], [0], [0], [1], [0, 0, 1, 1], [], []>} : vector<4x4xf32>, vector<4x256xf32>, vector<4x256xf32> -> vector<4x256xf32>
    %44 = arith.addf %39, %43 : vector<4x256xf32>
    %cst_29 = arith.constant 0.000000e+00 : f32
    %45 = vector.shape_cast %20 : vector<1x256xi1> to vector<1x256xi1>
    %46 = vector.broadcast %45 : vector<1x256xi1> to vector<4x256xi1>
    %47 = vector.broadcast %cst_29 : f32 to vector<4x256xf32>
    %48 = arith.select %46, %44, %47 : vector<4x256xi1>, vector<4x256xf32>
    %49 = arith.addf %28, %48 : vector<4x256xf32>
    %cst_30 = arith.constant 0.000000e+00 : f32
    %50 = vector.broadcast %cst_30 : f32 to vector<4x256xf32>
    %c0_31 = arith.constant 0 : index
    %c112 = arith.constant 112 : index
    %51 = vector.load %arg5[%c0_31, %c112] : memref<4x401xf32, #tpu.memory_space<vmem>>, vector<4x256xf32>
    %c0_32 = arith.constant 0 : index
    %c1_33 = arith.constant 1 : index
    %c0_34 = arith.constant 0 : index
    %c0_35 = arith.constant 0 : index
    %52 = vector.load %arg2[%c0_32, %c1_33, %c0_34, %c0_35] : memref<3x3x4x4xf32, #tpu.memory_space<vmem>>, vector<1x1x4x4xf32>
    %53 = vector.shape_cast %52 : vector<1x1x4x4xf32> to vector<4x4xf32>
    %cst_36 = arith.constant dense<0.000000e+00> : vector<4x256xf32>
    %54 = tpu.matmul %53, %51, %cst_36 {dimension_numbers = #tpu.dot_dimension_numbers<[1], [0], [0], [1], [0, 0, 1, 1], [], []>} : vector<4x4xf32>, vector<4x256xf32>, vector<4x256xf32> -> vector<4x256xf32>
    %55 = arith.addf %50, %54 : vector<4x256xf32>
    %c0_37 = arith.constant 0 : index
    %c128_38 = arith.constant 128 : index
    %56 = vector.load %arg5[%c0_37, %c128_38] : memref<4x401xf32, #tpu.memory_space<vmem>>, vector<4x256xf32>
    %c1_39 = arith.constant 1 : index
    %c1_40 = arith.constant 1 : index
    %c0_41 = arith.constant 0 : index
    %c0_42 = arith.constant 0 : index
    %57 = vector.load %arg2[%c1_39, %c1_40, %c0_41, %c0_42] : memref<3x3x4x4xf32, #tpu.memory_space<vmem>>, vector<1x1x4x4xf32>
    %58 = vector.shape_cast %57 : vector<1x1x4x4xf32> to vector<4x4xf32>
    %cst_43 = arith.constant dense<0.000000e+00> : vector<4x256xf32>
    %59 = tpu.matmul %58, %56, %cst_43 {dimension_numbers = #tpu.dot_dimension_numbers<[1], [0], [0], [1], [0, 0, 1, 1], [], []>} : vector<4x4xf32>, vector<4x256xf32>, vector<4x256xf32> -> vector<4x256xf32>
    %60 = arith.addf %55, %59 : vector<4x256xf32>
    %c0_44 = arith.constant 0 : index
    %c144 = arith.constant 144 : index
    %61 = vector.load %arg5[%c0_44, %c144] : memref<4x401xf32, #tpu.memory_space<vmem>>, vector<4x256xf32>
    %c2_45 = arith.constant 2 : index
    %c1_46 = arith.constant 1 : index
    %c0_47 = arith.constant 0 : index
    %c0_48 = arith.constant 0 : index
    %62 = vector.load %arg2[%c2_45, %c1_46, %c0_47, %c0_48] : memref<3x3x4x4xf32, #tpu.memory_space<vmem>>, vector<1x1x4x4xf32>
    %63 = vector.shape_cast %62 : vector<1x1x4x4xf32> to vector<4x4xf32>
    %cst_49 = arith.constant dense<0.000000e+00> : vector<4x256xf32>
    %64 = tpu.matmul %63, %61, %cst_49 {dimension_numbers = #tpu.dot_dimension_numbers<[1], [0], [0], [1], [0, 0, 1, 1], [], []>} : vector<4x4xf32>, vector<4x256xf32>, vector<4x256xf32> -> vector<4x256xf32>
    %65 = arith.addf %60, %64 : vector<4x256xf32>
    %66 = arith.addf %49, %65 : vector<4x256xf32>
    %cst_50 = arith.constant 0.000000e+00 : f32
    %67 = vector.broadcast %cst_50 : f32 to vector<4x256xf32>
    %c0_51 = arith.constant 0 : index
    %c113 = arith.constant 113 : index
    %68 = vector.load %arg5[%c0_51, %c113] : memref<4x401xf32, #tpu.memory_space<vmem>>, vector<4x256xf32>
    %c0_52 = arith.constant 0 : index
    %c2_53 = arith.constant 2 : index
    %c0_54 = arith.constant 0 : index
    %c0_55 = arith.constant 0 : index
    %69 = vector.load %arg2[%c0_52, %c2_53, %c0_54, %c0_55] : memref<3x3x4x4xf32, #tpu.memory_space<vmem>>, vector<1x1x4x4xf32>
    %70 = vector.shape_cast %69 : vector<1x1x4x4xf32> to vector<4x4xf32>
    %cst_56 = arith.constant dense<0.000000e+00> : vector<4x256xf32>
    %71 = tpu.matmul %70, %68, %cst_56 {dimension_numbers = #tpu.dot_dimension_numbers<[1], [0], [0], [1], [0, 0, 1, 1], [], []>} : vector<4x4xf32>, vector<4x256xf32>, vector<4x256xf32> -> vector<4x256xf32>
    %72 = arith.addf %67, %71 : vector<4x256xf32>
    %c0_57 = arith.constant 0 : index
    %c129 = arith.constant 129 : index
    %73 = vector.load %arg5[%c0_57, %c129] : memref<4x401xf32, #tpu.memory_space<vmem>>, vector<4x256xf32>
    %c1_58 = arith.constant 1 : index
    %c2_59 = arith.constant 2 : index
    %c0_60 = arith.constant 0 : index
    %c0_61 = arith.constant 0 : index
    %74 = vector.load %arg2[%c1_58, %c2_59, %c0_60, %c0_61] : memref<3x3x4x4xf32, #tpu.memory_space<vmem>>, vector<1x1x4x4xf32>
    %75 = vector.shape_cast %74 : vector<1x1x4x4xf32> to vector<4x4xf32>
    %cst_62 = arith.constant dense<0.000000e+00> : vector<4x256xf32>
    %76 = tpu.matmul %75, %73, %cst_62 {dimension_numbers = #tpu.dot_dimension_numbers<[1], [0], [0], [1], [0, 0, 1, 1], [], []>} : vector<4x4xf32>, vector<4x256xf32>, vector<4x256xf32> -> vector<4x256xf32>
    %77 = arith.addf %72, %76 : vector<4x256xf32>
    %c0_63 = arith.constant 0 : index
    %c145 = arith.constant 145 : index
    %78 = vector.load %arg5[%c0_63, %c145] : memref<4x401xf32, #tpu.memory_space<vmem>>, vector<4x256xf32>
    %c2_64 = arith.constant 2 : index
    %c2_65 = arith.constant 2 : index
    %c0_66 = arith.constant 0 : index
    %c0_67 = arith.constant 0 : index
    %79 = vector.load %arg2[%c2_64, %c2_65, %c0_66, %c0_67] : memref<3x3x4x4xf32, #tpu.memory_space<vmem>>, vector<1x1x4x4xf32>
    %80 = vector.shape_cast %79 : vector<1x1x4x4xf32> to vector<4x4xf32>
    %cst_68 = arith.constant dense<0.000000e+00> : vector<4x256xf32>
    %81 = tpu.matmul %80, %78, %cst_68 {dimension_numbers = #tpu.dot_dimension_numbers<[1], [0], [0], [1], [0, 0, 1, 1], [], []>} : vector<4x4xf32>, vector<4x256xf32>, vector<4x256xf32> -> vector<4x256xf32>
    %82 = arith.addf %77, %81 : vector<4x256xf32>
    %cst_69 = arith.constant 0.000000e+00 : f32
    %83 = vector.shape_cast %22 : vector<1x256xi1> to vector<1x256xi1>
    %84 = vector.broadcast %83 : vector<1x256xi1> to vector<4x256xi1>
    %85 = vector.broadcast %cst_69 : f32 to vector<4x256xf32>
    %86 = arith.select %84, %82, %85 : vector<4x256xi1>, vector<4x256xf32>
    %87 = arith.addf %66, %86 : vector<4x256xf32>
    %cst_70 = arith.constant dense<0.000000e+00> : vector<4xf32>
    %88 = vector.multi_reduction <add>, %87, %cst_70 [1] : vector<4x256xf32> to vector<4xf32>
    %89 = vector.shape_cast %88 : vector<4xf32> to vector<4x1xf32>
    %cst_71 = arith.constant 2.560000e+02 : f32
    %90 = vector.broadcast %cst_71 : f32 to vector<4x1xf32>
    %91 = arith.divf %89, %90 : vector<4x1xf32>
    %92 = vector.broadcast %91 : vector<4x1xf32> to vector<4x256xf32>
    %93 = arith.subf %87, %92 : vector<4x256xf32>
    %94 = arith.mulf %93, %93 : vector<4x256xf32>
    %cst_72 = arith.constant dense<0.000000e+00> : vector<4xf32>
    %95 = vector.multi_reduction <add>, %94, %cst_72 [1] : vector<4x256xf32> to vector<4xf32>
    %96 = vector.shape_cast %95 : vector<4xf32> to vector<4x1xf32>
    %cst_73 = arith.constant 2.560000e+02 : f32
    %97 = vector.broadcast %cst_73 : f32 to vector<4x1xf32>
    %98 = arith.divf %96, %97 : vector<4x1xf32>
    %99 = vector.broadcast %91 : vector<4x1xf32> to vector<4x256xf32>
    %100 = arith.subf %87, %99 : vector<4x256xf32>
    %cst_74 = arith.constant 9.99999974E-6 : f32
    %101 = vector.broadcast %cst_74 : f32 to vector<4x1xf32>
    %102 = arith.addf %98, %101 : vector<4x1xf32>
    %103 = math.rsqrt %102 : vector<4x1xf32>
    %104 = vector.broadcast %103 : vector<4x1xf32> to vector<4x256xf32>
    %105 = arith.mulf %100, %104 : vector<4x256xf32>
    %cst_75 = arith.constant 0.000000e+00 : f32
    %106 = vector.broadcast %cst_75 : f32 to vector<4x256xf32>
    %107 = arith.maximumf %105, %106 : vector<4x256xf32>
    %c0_76 = arith.constant 0 : index
    %c128_77 = arith.constant 128 : index
    %108 = vector.load %arg5[%c0_76, %c128_77] : memref<4x401xf32, #tpu.memory_space<vmem>>, vector<4x256xf32>
    tpu.vector_store %arg5[%c0_76, %c128_77], %107 {strides = array<i32>} : memref<4x401xf32, #tpu.memory_space<vmem>>, vector<4x256xf32>,
    %cst_78 = arith.constant 0.000000e+00 : f32
    %109 = vector.broadcast %cst_78 : f32 to vector<4x256xf32>
    %cst_79 = arith.constant 0.000000e+00 : f32
    %110 = vector.broadcast %cst_79 : f32 to vector<4x256xf32>
    %c0_80 = arith.constant 0 : index
    %c111_81 = arith.constant 111 : index
    %111 = vector.load %arg5[%c0_80, %c111_81] : memref<4x401xf32, #tpu.memory_space<vmem>>, vector<4x256xf32>
    %c0_82 = arith.constant 0 : index
    %c0_83 = arith.constant 0 : index
    %c0_84 = arith.constant 0 : index
    %c0_85 = arith.constant 0 : index
    %112 = vector.load %arg3[%c0_82, %c0_83, %c0_84, %c0_85] : memref<3x3x4x4xf32, #tpu.memory_space<vmem>>, vector<1x1x4x4xf32>
    %113 = vector.shape_cast %112 : vector<1x1x4x4xf32> to vector<4x4xf32>
    %cst_86 = arith.constant dense<0.000000e+00> : vector<4x256xf32>
    %114 = tpu.matmul %113, %111, %cst_86 {dimension_numbers = #tpu.dot_dimension_numbers<[1], [0], [0], [1], [0, 0, 1, 1], [], []>} : vector<4x4xf32>, vector<4x256xf32>, vector<4x256xf32> -> vector<4x256xf32>
    %115 = arith.addf %110, %114 : vector<4x256xf32>
    %c0_87 = arith.constant 0 : index
    %c127_88 = arith.constant 127 : index
    %116 = vector.load %arg5[%c0_87, %c127_88] : memref<4x401xf32, #tpu.memory_space<vmem>>, vector<4x256xf32>
    %c1_89 = arith.constant 1 : index
    %c0_90 = arith.constant 0 : index
    %c0_91 = arith.constant 0 : index
    %c0_92 = arith.constant 0 : index
    %117 = vector.load %arg3[%c1_89, %c0_90, %c0_91, %c0_92] : memref<3x3x4x4xf32, #tpu.memory_space<vmem>>, vector<1x1x4x4xf32>
    %118 = vector.shape_cast %117 : vector<1x1x4x4xf32> to vector<4x4xf32>
    %cst_93 = arith.constant dense<0.000000e+00> : vector<4x256xf32>
    %119 = tpu.matmul %118, %116, %cst_93 {dimension_numbers = #tpu.dot_dimension_numbers<[1], [0], [0], [1], [0, 0, 1, 1], [], []>} : vector<4x4xf32>, vector<4x256xf32>, vector<4x256xf32> -> vector<4x256xf32>
    %120 = arith.addf %115, %119 : vector<4x256xf32>
    %c0_94 = arith.constant 0 : index
    %c143_95 = arith.constant 143 : index
    %121 = vector.load %arg5[%c0_94, %c143_95] : memref<4x401xf32, #tpu.memory_space<vmem>>, vector<4x256xf32>
    %c2_96 = arith.constant 2 : index
    %c0_97 = arith.constant 0 : index
    %c0_98 = arith.constant 0 : index
    %c0_99 = arith.constant 0 : index
    %122 = vector.load %arg3[%c2_96, %c0_97, %c0_98, %c0_99] : memref<3x3x4x4xf32, #tpu.memory_space<vmem>>, vector<1x1x4x4xf32>
    %123 = vector.shape_cast %122 : vector<1x1x4x4xf32> to vector<4x4xf32>
    %cst_100 = arith.constant dense<0.000000e+00> : vector<4x256xf32>
    %124 = tpu.matmul %123, %121, %cst_100 {dimension_numbers = #tpu.dot_dimension_numbers<[1], [0], [0], [1], [0, 0, 1, 1], [], []>} : vector<4x4xf32>, vector<4x256xf32>, vector<4x256xf32> -> vector<4x256xf32>
    %125 = arith.addf %120, %124 : vector<4x256xf32>
    %cst_101 = arith.constant 0.000000e+00 : f32
    %126 = vector.shape_cast %20 : vector<1x256xi1> to vector<1x256xi1>
    %127 = vector.broadcast %126 : vector<1x256xi1> to vector<4x256xi1>
    %128 = vector.broadcast %cst_101 : f32 to vector<4x256xf32>
    %129 = arith.select %127, %125, %128 : vector<4x256xi1>, vector<4x256xf32>
    %130 = arith.addf %109, %129 : vector<4x256xf32>
    %cst_102 = arith.constant 0.000000e+00 : f32
    %131 = vector.broadcast %cst_102 : f32 to vector<4x256xf32>
    %c0_103 = arith.constant 0 : index
    %c112_104 = arith.constant 112 : index
    %132 = vector.load %arg5[%c0_103, %c112_104] : memref<4x401xf32, #tpu.memory_space<vmem>>, vector<4x256xf32>
    %c0_105 = arith.constant 0 : index
    %c1_106 = arith.constant 1 : index
    %c0_107 = arith.constant 0 : index
    %c0_108 = arith.constant 0 : index
    %133 = vector.load %arg3[%c0_105, %c1_106, %c0_107, %c0_108] : memref<3x3x4x4xf32, #tpu.memory_space<vmem>>, vector<1x1x4x4xf32>
    %134 = vector.shape_cast %133 : vector<1x1x4x4xf32> to vector<4x4xf32>
    %cst_109 = arith.constant dense<0.000000e+00> : vector<4x256xf32>
    %135 = tpu.matmul %134, %132, %cst_109 {dimension_numbers = #tpu.dot_dimension_numbers<[1], [0], [0], [1], [0, 0, 1, 1], [], []>} : vector<4x4xf32>, vector<4x256xf32>, vector<4x256xf32> -> vector<4x256xf32>
    %136 = arith.addf %131, %135 : vector<4x256xf32>
    %c0_110 = arith.constant 0 : index
    %c128_111 = arith.constant 128 : index
    %137 = vector.load %arg5[%c0_110, %c128_111] : memref<4x401xf32, #tpu.memory_space<vmem>>, vector<4x256xf32>
    %c1_112 = arith.constant 1 : index
    %c1_113 = arith.constant 1 : index
    %c0_114 = arith.constant 0 : index
    %c0_115 = arith.constant 0 : index
    %138 = vector.load %arg3[%c1_112, %c1_113, %c0_114, %c0_115] : memref<3x3x4x4xf32, #tpu.memory_space<vmem>>, vector<1x1x4x4xf32>
    %139 = vector.shape_cast %138 : vector<1x1x4x4xf32> to vector<4x4xf32>
    %cst_116 = arith.constant dense<0.000000e+00> : vector<4x256xf32>
    %140 = tpu.matmul %139, %137, %cst_116 {dimension_numbers = #tpu.dot_dimension_numbers<[1], [0], [0], [1], [0, 0, 1, 1], [], []>} : vector<4x4xf32>, vector<4x256xf32>, vector<4x256xf32> -> vector<4x256xf32>
    %141 = arith.addf %136, %140 : vector<4x256xf32>
    %c0_117 = arith.constant 0 : index
    %c144_118 = arith.constant 144 : index
    %142 = vector.load %arg5[%c0_117, %c144_118] : memref<4x401xf32, #tpu.memory_space<vmem>>, vector<4x256xf32>
    %c2_119 = arith.constant 2 : index
    %c1_120 = arith.constant 1 : index
    %c0_121 = arith.constant 0 : index
    %c0_122 = arith.constant 0 : index
    %143 = vector.load %arg3[%c2_119, %c1_120, %c0_121, %c0_122] : memref<3x3x4x4xf32, #tpu.memory_space<vmem>>, vector<1x1x4x4xf32>
    %144 = vector.shape_cast %143 : vector<1x1x4x4xf32> to vector<4x4xf32>
    %cst_123 = arith.constant dense<0.000000e+00> : vector<4x256xf32>
    %145 = tpu.matmul %144, %142, %cst_123 {dimension_numbers = #tpu.dot_dimension_numbers<[1], [0], [0], [1], [0, 0, 1, 1], [], []>} : vector<4x4xf32>, vector<4x256xf32>, vector<4x256xf32> -> vector<4x256xf32>
    %146 = arith.addf %141, %145 : vector<4x256xf32>
    %147 = arith.addf %130, %146 : vector<4x256xf32>
    %cst_124 = arith.constant 0.000000e+00 : f32
    %148 = vector.broadcast %cst_124 : f32 to vector<4x256xf32>
    %c0_125 = arith.constant 0 : index
    %c113_126 = arith.constant 113 : index
    %149 = vector.load %arg5[%c0_125, %c113_126] : memref<4x401xf32, #tpu.memory_space<vmem>>, vector<4x256xf32>
    %c0_127 = arith.constant 0 : index
    %c2_128 = arith.constant 2 : index
    %c0_129 = arith.constant 0 : index
    %c0_130 = arith.constant 0 : index
    %150 = vector.load %arg3[%c0_127, %c2_128, %c0_129, %c0_130] : memref<3x3x4x4xf32, #tpu.memory_space<vmem>>, vector<1x1x4x4xf32>
    %151 = vector.shape_cast %150 : vector<1x1x4x4xf32> to vector<4x4xf32>
    %cst_131 = arith.constant dense<0.000000e+00> : vector<4x256xf32>
    %152 = tpu.matmul %151, %149, %cst_131 {dimension_numbers = #tpu.dot_dimension_numbers<[1], [0], [0], [1], [0, 0, 1, 1], [], []>} : vector<4x4xf32>, vector<4x256xf32>, vector<4x256xf32> -> vector<4x256xf32>
    %153 = arith.addf %148, %152 : vector<4x256xf32>
    %c0_132 = arith.constant 0 : index
    %c129_133 = arith.constant 129 : index
    %154 = vector.load %arg5[%c0_132, %c129_133] : memref<4x401xf32, #tpu.memory_space<vmem>>, vector<4x256xf32>
    %c1_134 = arith.constant 1 : index
    %c2_135 = arith.constant 2 : index
    %c0_136 = arith.constant 0 : index
    %c0_137 = arith.constant 0 : index
    %155 = vector.load %arg3[%c1_134, %c2_135, %c0_136, %c0_137] : memref<3x3x4x4xf32, #tpu.memory_space<vmem>>, vector<1x1x4x4xf32>
    %156 = vector.shape_cast %155 : vector<1x1x4x4xf32> to vector<4x4xf32>
    %cst_138 = arith.constant dense<0.000000e+00> : vector<4x256xf32>
    %157 = tpu.matmul %156, %154, %cst_138 {dimension_numbers = #tpu.dot_dimension_numbers<[1], [0], [0], [1], [0, 0, 1, 1], [], []>} : vector<4x4xf32>, vector<4x256xf32>, vector<4x256xf32> -> vector<4x256xf32>
    %158 = arith.addf %153, %157 : vector<4x256xf32>
    %c0_139 = arith.constant 0 : index
    %c145_140 = arith.constant 145 : index
    %159 = vector.load %arg5[%c0_139, %c145_140] : memref<4x401xf32, #tpu.memory_space<vmem>>, vector<4x256xf32>
    %c2_141 = arith.constant 2 : index
    %c2_142 = arith.constant 2 : index
    %c0_143 = arith.constant 0 : index
    %c0_144 = arith.constant 0 : index
    %160 = vector.load %arg3[%c2_141, %c2_142, %c0_143, %c0_144] : memref<3x3x4x4xf32, #tpu.memory_space<vmem>>, vector<1x1x4x4xf32>
    %161 = vector.shape_cast %160 : vector<1x1x4x4xf32> to vector<4x4xf32>
    %cst_145 = arith.constant dense<0.000000e+00> : vector<4x256xf32>
    %162 = tpu.matmul %161, %159, %cst_145 {dimension_numbers = #tpu.dot_dimension_numbers<[1], [0], [0], [1], [0, 0, 1, 1], [], []>} : vector<4x4xf32>, vector<4x256xf32>, vector<4x256xf32> -> vector<4x256xf32>
    %163 = arith.addf %158, %162 : vector<4x256xf32>
    %cst_146 = arith.constant 0.000000e+00 : f32
    %164 = vector.shape_cast %22 : vector<1x256xi1> to vector<1x256xi1>
    %165 = vector.broadcast %164 : vector<1x256xi1> to vector<4x256xi1>
    %166 = vector.broadcast %cst_146 : f32 to vector<4x256xf32>
    %167 = arith.select %165, %163, %166 : vector<4x256xi1>, vector<4x256xf32>
    %168 = arith.addf %147, %167 : vector<4x256xf32>
    %cst_147 = arith.constant dense<0.000000e+00> : vector<4xf32>
    %169 = vector.multi_reduction <add>, %168, %cst_147 [1] : vector<4x256xf32> to vector<4xf32>
    %170 = vector.shape_cast %169 : vector<4xf32> to vector<4x1xf32>
    %cst_148 = arith.constant 2.560000e+02 : f32
    %171 = vector.broadcast %cst_148 : f32 to vector<4x1xf32>
    %172 = arith.divf %170, %171 : vector<4x1xf32>
    %173 = vector.broadcast %172 : vector<4x1xf32> to vector<4x256xf32>
    %174 = arith.subf %168, %173 : vector<4x256xf32>
    %175 = arith.mulf %174, %174 : vector<4x256xf32>
    %cst_149 = arith.constant dense<0.000000e+00> : vector<4xf32>
    %176 = vector.multi_reduction <add>, %175, %cst_149 [1] : vector<4x256xf32> to vector<4xf32>
    %177 = vector.shape_cast %176 : vector<4xf32> to vector<4x1xf32>
    %cst_150 = arith.constant 2.560000e+02 : f32
    %178 = vector.broadcast %cst_150 : f32 to vector<4x1xf32>
    %179 = arith.divf %177, %178 : vector<4x1xf32>
    %180 = vector.broadcast %172 : vector<4x1xf32> to vector<4x256xf32>
    %181 = arith.subf %168, %180 : vector<4x256xf32>
    %cst_151 = arith.constant 9.99999974E-6 : f32
    %182 = vector.broadcast %cst_151 : f32 to vector<4x1xf32>
    %183 = arith.addf %179, %182 : vector<4x1xf32>
    %184 = math.rsqrt %183 : vector<4x1xf32>
    %185 = vector.broadcast %184 : vector<4x1xf32> to vector<4x256xf32>
    %186 = arith.mulf %181, %185 : vector<4x256xf32>
    %187 = arith.addf %1, %186 : vector<4x256xf32>
    %c0_152 = arith.constant 0 : index
    %c0_153 = arith.constant 0 : index
    %c0_154 = arith.constant 0 : index
    %188 = vector.load %arg4[%c0_152, %c0_153, %c0_154] : memref<1x4x256xf32, #tpu.memory_space<vmem>>, vector<1x4x256xf32>
    %189 = vector.shape_cast %188 : vector<1x4x256xf32> to vector<4x256xf32>
    %190 = vector.shape_cast %187 : vector<4x256xf32> to vector<1x4x256xf32>
    tpu.vector_store %arg4[%c0_152, %c0_153, %c0_154], %190 {strides = array<i32>} : memref<1x4x256xf32, #tpu.memory_space<vmem>>, vector<1x4x256xf32>,
    return
  }
  func.func @transform_0(%arg0: i32) -> (i32, i32, i32) {
    %c0_i32 = arith.constant 0 : i32
    %c0_i32_0 = arith.constant 0 : i32
    %c0_i32_1 = arith.constant 0 : i32
    return %arg0, %c0_i32, %c0_i32_0 : i32, i32, i32
  }
  func.func @transform_1(%arg0: i32) -> (i32, i32, i32, i32) {
    %c0_i32 = arith.constant 0 : i32
    %c0_i32_0 = arith.constant 0 : i32
    %c0_i32_1 = arith.constant 0 : i32
    %c0_i32_2 = arith.constant 0 : i32
    %c0_i32_3 = arith.constant 0 : i32
    return %c0_i32, %c0_i32_0, %c0_i32_1, %c0_i32_2 : i32, i32, i32, i32
  }
  func.func @transform_2(%arg0: i32) -> (i32, i32, i32, i32) {
    %c0_i32 = arith.constant 0 : i32
    %c0_i32_0 = arith.constant 0 : i32
    %c0_i32_1 = arith.constant 0 : i32
    %c0_i32_2 = arith.constant 0 : i32
    %c0_i32_3 = arith.constant 0 : i32
    return %c0_i32, %c0_i32_0, %c0_i32_1, %c0_i32_2 : i32, i32, i32, i32
  }
  func.func @transform_3(%arg0: i32) -> (i32, i32, i32) {
    %c0_i32 = arith.constant 0 : i32
    %c0_i32_0 = arith.constant 0 : i32
    %c0_i32_1 = arith.constant 0 : i32
    return %arg0, %c0_i32, %c0_i32_0 : i32, i32, i32
  }
}

</mosaic_0001>

<bundles_post_ra>
// kernel: tpu_custom_call.1
= control target key start
LH: loop header
LB: loop body
LE: loop exit
PB: predicated region body
PF: predicated region fallthrough
CT: control target
= control target key end

     0   :  { %8 = vsyncpa [#allocation4], 0  ;;  %s2418_s0 = inlined_call_operand.hbm [shape: f32[2,4,256], index: 0, kind: input, shape index: {}]   ;;  %s2419_s1 = inlined_call_operand.hbm [shape: f32[3,3,4,4], index: 1, kind: input, shape index: {}]   ;;  %s2420_s2 = inlined_call_operand.hbm [shape: f32[3,3,4,4], index: 2, kind: input, shape index: {}]   ;;  %s2421_s3 = inlined_call_operand.hbm [shape: f32[2,4,256], index: 3, kind: output, shape index: {}]  }
   0x1   :  { %10 = vsyncpa [#allocation4 + $0x1], 0 }
   0x2   :  { %11 = vsyncpa [#allocation7], 0 }
   0x3   :  { %12 = vsyncpa [#allocation5], 0 }
   0x4   :  { %14 = vsyncpa [#allocation5 + $0x1], 0  ;;  %s2037_s12 = smov 0   ;;  %s2039_s13 = smov 0  }
   0x5   :  { %s2041_s14 = smov 0   ;;  %s2043_s15 = smov 0  }
   0x6 LB: > { %s130_s18 = sshll.u32 %s2419_s1, 4  ;;  %s2061_s19 = sadd.s32 4294967295, %s2001_s15   ;;  %s2001_s15 = sphi %s2043_s15, %s2443_s15   ;;  %s1997_s14 = sphi %s2041_s14, %s2442_s14   ;;  %s1993_s13 = sphi %s2039_s13, %s2441_s13   ;;  %s1989_s12 = sphi %s2037_s12, %s2440_s12   ;;  %s131_s18 = int_to_ptr.hbm [resolvable:$true] %s130_s18 }
   0x7   : > { %p1665_p0 = scmp.ge.s32.totalorder %s2001_s15, 1  ;;  %p41_p1 = scmp.eq.s32.totalorder %s2061_s19, 0 }
   0x8   : > { %p119_p2 = scmp.lt.s32.totalorder %s2001_s15, 3  ;;  %s2003_s21 = smov [#allocation6]  }
   0x9   : > { %s132_s22 = sshll.u32 %s2003_s21, 4  ;;  %s144_s25 = sshll.u32 %s2420_s2, 4  ;;  %s133_s22 = int_to_ptr.vmem [resolvable:$true] %s132_s22  ;;  %s145_s25 = int_to_ptr.hbm [resolvable:$true] %s144_s25 }
   0xa   : > { %p2066_p3 = pnand %p1665_p0, %p119_p2  ;;  %s2004_s26 = smov [#allocation8]  }
   0xb   : > { %s146_s27 = sshll.u32 %s2004_s26, 4  ;;  %s2005_s28 = smov 64   ;;  %s147_s27 = int_to_ptr.vmem [resolvable:$true] %s146_s27 }
   0xc   : > { %p1768_p4 = pneg %p2066_p3  ;;  %s2006_s29 = smov 4  }
   0xd   : > { %s1664_s30 = sadd.s32 4294967294, %s2001_s15   ;;  %s2080_s4 = sadd.s32 1, %s2001_s15  }
   0xe   : > { %p1769_p6 = pnand %p1768_p4, %p41_p1  ;;  %s24_s5 = ssub.s32 %s2001_s15, %s2080_s4 }
   0xf   : > { %s27_s6 = sadd.s32 1, %s1997_s14  ;;  %p25_p7 = scmp.eq.s32.totalorder %s24_s5, 0 }
  0x10   : > { %1771 = dma.hbm_to_vmem [thread:$0]  (!%p1769_p6), %s131_s18, 576, %s133_s22, [#allocation7], %s2005_s28, %s2005_s28, %s2006_s29  }
  0x11   : > { %1774 = dma.hbm_to_vmem [thread:$0]  (!%p1769_p6), %s145_s25, 576, %s147_s27, [#allocation7], %s2005_s28, %s2005_s28, %s2006_s29  }
  0x12   : > { %p34_p8 = scmp.ne.s32.totalorder %s1997_s14, %s1993_s13  ;;  %p35_p9 = scmp.eq.s32.totalorder %s2001_s15, 0 }
  0x13   : > { %p40_p10 = scmp.ne.s32.totalorder %s1993_s13, %s1989_s12  ;;  %p106_p13 = scmp.eq.s32.totalorder %s2061_s19, 1 }
  0x14   : > { %s2091_s7 = scalar_select %p25_p7, %s1997_s14, %s27_s6  }
  0x15   : > { %p2093_p11 = por %p35_p9, %p34_p8  ;;  %p2099_p12 = por %p41_p1, %p40_p10 }
  0x16   : > { %p112_p0 = scmp.eq.s32.totalorder %s1664_s30, 1  ;;  %p1785_p2 = scmp.lt.s32.totalorder %s2001_s15, 2 }
  0x17   : > { %s160_s10 = sand.u32 1, %s1997_s14   ;;  %p2106_p4 = por %p106_p13, %p34_p8 }
  0x18   : > { %p2110_p6 = por %p112_p0, %p40_p10  ;;  %s1669_s17 = sshll.u32 %s160_s10, 3 }
  0x19   : > { %s1754_s18 = sshll.u32 %s2001_s15, 3  ;;  %s164_s24 = scalar_lea.vmem [#allocation3], %s1669_s17 }
  0x1a   : > { %s169_s23 = scalar_lea.hbm %s2418_s0, %s1754_s18  ;;  %s173_s25 = sshll.u32 %s164_s24, 4  ;;  %s174_s25 = int_to_ptr.vmem [resolvable:$true] %s173_s25 }
  0x1b   : > { %s171_s26 = sshll.u32 %s169_s23, 4  ;;  %p2120_p7 = pnand %p1785_p2, %p2093_p11  ;;  %s172_s26 = int_to_ptr.hbm [resolvable:$true] %s171_s26 }
  0x1c   : > { %s161_s28 = scalar_lea.sflag [#allocation4], %s160_s10  ;;  %s1901_s29 = sshra.s32 %s172_s26, 4  ;;  %s1902_s29 = int_to_ptr.hbm [resolvable:$true] %s1901_s29 }
  0x1d   : > { %s1903_s30 = scalar_lea.hbm %s1902_s29, 8  ;;  %p1905_p9 = pneg %p2120_p7 }
  0x1e   : > { %p1904_p8 = scmp.ne.s32.totalorder %s1902_s29, %s1903_s30  ;;  %s1908_s17 = scalar_lea.hbm %s2418_s0, 16 }
  0x1f   : > { %p1909_p11 = scmp.lt.s32.totalorder %s1902_s29, %s2418_s0  ;;  %p1910_p0 = scmp.lt.s32.totalorder %s1908_s17, %s1903_s30 }
  0x20   : > { %p1906_p10 = pnand %p1905_p9, %p1904_p8 }
  0x21   : > { %p1911_p2 = por %p1910_p0, %p1909_p11 }
  0x22   : > { %p1907_p13 = pneg %p1906_p10 }
  0x24   : > { %p1912_p5 = pnand %p1911_p2, %p1907_p13 }
  0x26   : > { %1915 = shalt.err (!%p1912_p5)
}
  0x27   : > { %1778 = dma.hbm_to_vmem [thread:$0]  (!%p2120_p7), %s172_s26, 128, %s174_s25, %s161_s28  }
  0x28   : > { %182 = sbr.rel (%p2066_p3) target bundleno = 1268 (0x4f4), region = 32  ;;  %s2137_s10 = sand.u32 (!%p2066_p3), 1, %s1993_s13  }
  0x29   : > { %s1673_s21 = sshll.u32 (!%p2066_p3), %s2137_s10, 3  ;;  %s185_s22 = scalar_lea.sflag (!%p2066_p3), [#allocation4], %s2137_s10 }
  0x2a   : > { %s188_s23 = scalar_lea.vmem (!%p2066_p3), [#allocation3], %s1673_s21 }
  0x2d   : > { %1976 = dma.done.wait (%p2099_p12), %s185_s22, 128  }
  0x2e   : > { %1978 = vsyncadd (%p2099_p12), %s185_s22, 4294967168 }
  0x2f   : > { %1980 = dma.done.wait (%p41_p1), [#allocation7], 1152  }
  0x30   : > { %1982 = vsyncadd (%p41_p1), [#allocation7], 4294966144  ;;  %v2007_v0 = vmov 0.0   ;;  %v2151_v1 = vld [vmem:[%s188_s23] sm:$0xff]  ;;  %s2008_s20 = smov 1   ;;  %vm255_vm0 = vcmask 134144  }
  0x31   : > { %254 = vst [vmem:[#allocation2] sm:$0xf] %v2007_v0  ;;  %s2009_s9 = smov 17   ;;  %s2010_s24 = smov 113   ;;  %vm341_vm1 = vcmask 138240   ;;  %vm284_vm2 = vcmask 1043456  }
  0x32   : > { %257 = vst [vmem:[#allocation2 + $0x4] sm:$0xff] %v2151_v1  ;;  %s2011_s25 = smov 16   ;;  %s2012_s26 = smov 112   ;;  %v260_v38 = vld [vmem:[#allocation6] sm:$0xf]  ;;  %vm280_vm3 = vcmask 31744  }
  0x33   : > { %256 = vst.msk [vmem:[#allocation2 + $0xc] sm:$0xf] %vm255_vm0, %v2007_v0  ;;  %s2013_s27 = smov 127   ;;  %s2014_s28 = smov 15   ;;  %v475_v42 = vld [vmem:[#allocation6 + $0x10] sm:$0xf] }
  0x34   : > { %s2015_s29 = smov 111   ;;  %vm277_vm4 = vcmask 7168   ;;  %v262_v44 = vld [vmem:[#allocation6 + $0xc] sm:$0xf]  ;;  %vm409_vm5 = vcmask 924672   ;;  %vm541_vm6 = vcmask 130048  }
  0x35   : > { %v394_v52 = vld [vmem:[#allocation6 + $0x18] sm:$0xf]  ;;  %v472_v59 = vld [vmem:[#allocation6 + $0x4] sm:$0xf]  ;;  %vm609_vm7 = vcmask 916480   ;;  %vm685_vm8 = vcmask 1039360  }
  0x36   : > { %v594_v0 = vld [vmem:[#allocation6 + $0x1c] sm:$0xf]  ;;  %vm2422_vm9 = vcmask 121856   ;;  %vm817_vm10 = vcmask 908288   ;;  %s1755_s30 = sshll.u32 %s2061_s19, 3  ;;  %s221_s18 = scalar_lea.vmem [#allocation9], %s1673_s21 }
  0x37   : > { %s1570_s17 = scalar_lea.hbm %s2421_s3, %s1755_s30  ;;  %s1572_s8 = sshll.u32 %s221_s18, 4  ;;  %s1573_s8 = int_to_ptr.vmem [resolvable:$true] %s1572_s8 }
  0x38   : > { %s1574_s22 = sshll.u32 %s1570_s17, 4  ;;  %s1559_s19 = scalar_lea.sflag [#allocation5], %s2137_s10  ;;  %s1575_s22 = int_to_ptr.hbm [resolvable:$true] %s1574_s22 }
  0x39   : > { %v259_v2 = vld [vmem:[#allocation2 + $0x8] sm:$0xf]  ;;  %v2154_v3 = vld [vmem:[#allocation2] sm:$0xff]  ;;  %s1945_s23 = sshra.s32 %s1575_s22, 4  ;;  %s1951_s21 = scalar_lea.hbm %s2421_s3, 16  ;;  %s1946_s23 = int_to_ptr.hbm [resolvable:$true] %s1945_s23 }
  0x3a   : > { %267 = vst [vmem:[#allocation1 + $0x10] ss:$2 sm:$0xff] %v259_v2  ;;  %v392_v10 = vld [vmem:[#allocation2 + $0xc] sm:$0xf]  ;;  %v470_v14 = vld [vmem:[#allocation2 + $0x8] sm:$0xf]  ;;  %p1952_p12 = scmp.lt.s32.totalorder %s1946_s23, %s2421_s3 }
  0x3b   : > { %265 = vst [vmem:[#allocation1] ss:$2 sm:$0xff] %v2154_v3  ;;  %v592_v17 = vld [vmem:[#allocation2 + $0xc] sm:$0xf]  ;;  %v664_v23 = vld [vmem:[#allocation2 + $0x8] sm:$0xf] }
  0x3c   : > { %v668_v21 = vld [vmem:[#allocation2 + $0xc] sm:$0xf] }
  0x3d   : > { %v800_v27 = vld [vmem:[#allocation2 + $0xc] sm:$0xf] }
  0x41   : > { %v270_v4 = vld.sshfl [vmem:[#allocation1 + $0x10] sm:$0xff pattern:$0x75316420] }
  0x42   : > { %275 = vrot.lane.b32.xlu1 %v270_v4, %s2008_s20  ;;  %331 = vst [vmem:[#allocation1 + $0x10] ss:$2 sm:$0xff] %v259_v2  ;;  %v268_v5 = vld.sshfl [vmem:[#allocation1] sm:$0xff pattern:$0x75316420] }
  0x43   : > { %271 = vrot.lane.b32.xlu0 %v268_v5, %s2008_s20  ;;  %v269_v6 = vld.sshfl [vmem:[#allocation1 + $0x8] sm:$0xff pattern:$0x75316420] }
  0x44   : > { %329 = vst [vmem:[#allocation1] ss:$2 sm:$0xff] %v2154_v3 }
  0x49   : > { %v334_v7 = vld.sshfl [vmem:[#allocation1 + $0x10] sm:$0xff pattern:$0x75316420] }
  0x4a   : > { %399 = vst [vmem:[#allocation1 + $0x10] ss:$2 sm:$0xff] %v392_v10 }
  0x4b   : > { %273 = vrot.lane.b32.xlu0 %v269_v6, %s2008_s20  ;;  %v332_v8 = vld.sshfl [vmem:[#allocation1] sm:$0xff pattern:$0x75316420]  ;;  %v333_v9 = vld.sshfl [vmem:[#allocation1 + $0x8] sm:$0xff pattern:$0x75316420] }
  0x4c   : > { %335 = vrot.lane.b32.xlu1 %v332_v8, %s2009_s9  ;;  %337 = vrot.lane.b32.xlu2 %v333_v9, %s2009_s9  ;;  %397 = vst [vmem:[#allocation1] ss:$2 sm:$0xff] %v2151_v1 }
  0x51   : > { %v402_v13 = vld.sshfl [vmem:[#allocation1 + $0x10] sm:$0xff pattern:$0x75316420] }
  0x52   : > { %531 = vst [vmem:[#allocation1 + $0x10] ss:$2 sm:$0xff] %v470_v14 }
  0x53   : > { %v401_v11 = vld.sshfl [vmem:[#allocation1 + $0x8] sm:$0xff pattern:$0x75316420]  ;;  %v400_v12 = vld.sshfl [vmem:[#allocation1] sm:$0xff pattern:$0x75316420] }
  0x54   : > { %405 = vrot.lane.b32.xlu1 %v401_v11, %s2010_s24  ;;  %403 = vrot.lane.b32.xlu0 %v400_v12, %s2010_s24  ;;  %477 = vst [vmem:[#allocation1] ss:$2 sm:$0xff] %v2151_v1 }
  0x55   : > { %339 = vrot.lane.b32.xlu2 %v334_v7, %s2009_s9  ;;  %v670_v7 = vld [vmem:[#allocation6 + $0x14] sm:$0xf] }
  0x59   : > { %v534_v18 = vld.sshfl [vmem:[#allocation1 + $0x10] sm:$0xff pattern:$0x75316420] }
  0x5a   : > { %599 = vst [vmem:[#allocation1 + $0x10] ss:$2 sm:$0xff] %v592_v17 }
  0x5b   : > { %v2168_v15 = vld.sshfl [vmem:[#allocation1] sm:$0xff pattern:$0x75316420]  ;;  %v479_v16 = vld.sshfl [vmem:[#allocation1 + $0x8] sm:$0xff pattern:$0x75316420] }
  0x5c   : > { %529 = vst [vmem:[#allocation1] ss:$2 sm:$0xff] %v2154_v3 }
  0x5d   : > { %407 = vrot.lane.b32.xlu2 %v402_v13, %s2010_s24  ;;  %v666_v13 = vld [vmem:[#allocation6 + $0x8] sm:$0xf] }
  0x61   : > { %v602_v22 = vld.sshfl [vmem:[#allocation1 + $0x10] sm:$0xff pattern:$0x75316420] }
  0x62   : > { %675 = vst [vmem:[#allocation1 + $0x10] ss:$2 sm:$0xff] %v668_v21 }
  0x63   : > { %v533_v19 = vld.sshfl [vmem:[#allocation1 + $0x8] sm:$0xff pattern:$0x75316420]  ;;  %v532_v20 = vld.sshfl [vmem:[#allocation1] sm:$0xff pattern:$0x75316420] }
  0x64   : > { %537 = vrot.lane.b32.xlu1 %v533_v19, %s2011_s25  ;;  %535 = vrot.lane.b32.xlu0 %v532_v20, %s2011_s25  ;;  %597 = vst [vmem:[#allocation1] ss:$2 sm:$0xff] %v2151_v1  ;;  %v802_v19 = vld [vmem:[#allocation6 + $0x20] sm:$0xf] }
  0x65   : > { %539 = vrot.lane.b32.xlu2 %v534_v18, %s2011_s25 }
  0x69   : > { %v678_v26 = vld.sshfl [vmem:[#allocation1 + $0x10] sm:$0xff pattern:$0x75316420] }
  0x6a   : > { %739 = vst [vmem:[#allocation1 + $0x10] ss:$2 sm:$0xff] %v664_v23 }
  0x6b   : > { %v601_v24 = vld.sshfl [vmem:[#allocation1 + $0x8] sm:$0xff pattern:$0x75316420]  ;;  %v600_v25 = vld.sshfl [vmem:[#allocation1] sm:$0xff pattern:$0x75316420] }
  0x6c   : > { %605 = vrot.lane.b32.xlu1 %v601_v24, %s2012_s26  ;;  %603 = vrot.lane.b32.xlu0 %v600_v25, %s2012_s26  ;;  %673 = vst [vmem:[#allocation1] ss:$2 sm:$0xff] %v2151_v1 }
  0x6d   : > { %607 = vrot.lane.b32.xlu2 %v602_v22, %s2012_s26 }
  0x71   : > { %v742_v30 = vld.sshfl [vmem:[#allocation1 + $0x10] sm:$0xff pattern:$0x75316420] }
  0x72   : > { %807 = vst [vmem:[#allocation1 + $0x10] ss:$2 sm:$0xff] %v800_v27 }
  0x73   : > { %v677_v28 = vld.sshfl [vmem:[#allocation1 + $0x8] sm:$0xff pattern:$0x75316420]  ;;  %v676_v29 = vld.sshfl [vmem:[#allocation1] sm:$0xff pattern:$0x75316420] }
  0x74   : > { %681 = vrot.lane.b32.xlu1 %v677_v28, %s2013_s27  ;;  %679 = vrot.lane.b32.xlu0 %v676_v29, %s2013_s27  ;;  %737 = vst [vmem:[#allocation1] ss:$2 sm:$0xff] %v2154_v3 }
  0x75   : > { %683 = vrot.lane.b32.xlu2 %v678_v26, %s2013_s27 }
  0x79   : > { %v810_v33 = vld.sshfl [vmem:[#allocation1 + $0x10] sm:$0xff pattern:$0x75316420] }
  0x7b   : > { %v741_v31 = vld.sshfl [vmem:[#allocation1 + $0x8] sm:$0xff pattern:$0x75316420]  ;;  %v740_v32 = vld.sshfl [vmem:[#allocation1] sm:$0xff pattern:$0x75316420] }
  0x7c   : > { %745 = vrot.lane.b32.xlu1 %v741_v31, %s2014_s28  ;;  %743 = vrot.lane.b32.xlu0 %v740_v32, %s2014_s28  ;;  %805 = vst [vmem:[#allocation1] ss:$2 sm:$0xff] %v2151_v1 }
  0x7d   : > { %747 = vrot.lane.b32.xlu2 %v742_v30, %s2014_s28  ;;  %v223_v30 = vlaneseq }
  0x83   : > { %v809_v34 = vld.sshfl [vmem:[#allocation1 + $0x8] sm:$0xff pattern:$0x75316420]  ;;  %v808_v35 = vld.sshfl [vmem:[#allocation1] sm:$0xff pattern:$0x75316420] }
  0x84   : > { %813 = vrot.lane.b32.xlu1 %v809_v34, %s2015_s29  ;;  %811 = vrot.lane.b32.xlu0 %v808_v35, %s2015_s29 }
  0x85   : > { %815 = vrot.lane.b32.xlu2 %v810_v33, %s2015_s29  ;;  %v224_v33 = vand.u32 127, %v223_v30 }
  0xa6   : > { %v338_v36 = vpop.permute.xlu2 %337 }
  0xaf   : > { %v340_v37 = vpop.permute.xlu2 %339 }
  0xb0   : > { %v343_v39 = vsel %vm341_vm1, %v338_v36, %v340_v37 }
  0xb1   : > { %1683 = vmatpush.msk.msra.mxu3 %vm284_vm2, %v343_v39 }
  0xb2   : > { %1684 = vmatmul.msk.f32.vlgmr.msra.gmra.mxu3 %vm280_vm3, %v260_v38 }
  0xb3   : > { %1691 = vmatpush.msk.msrb.mxu3 %vm284_vm2, %v479_v16 }
  0xb4   : > { %v276_v40 = vpop.permute.xlu1 %275 }
  0xb5   : > { %v272_v41 = vpop.permute.xlu0 %271 }
  0xb7   : > { %v408_v49 = vpop.permute.xlu2 %407 }
  0xba   : > { %1692 = vmatmul.msk.f32.vlgmr.msrb.gmra.mxu3 %vm280_vm3, %v475_v42 }
  0xbd   : > { %v274_v43 = vpop.permute.xlu0 %273 }
  0xbe   : > { %v336_v45 = vpop.permute.xlu1 %335  ;;  %v278_v46 = vsel %vm277_vm4, %v272_v41, %v274_v43  ;;  %v279_v47 = vsel %vm277_vm4, %v274_v43, %v276_v40  ;;  %v230_v41 = vand.u32 15, %v224_v33 }
  0xbf   : > { %1677 = vmatpush.msk.msra.mxu0 %vm284_vm2, %v278_v46  ;;  %1679 = vmatpush.msk.msra.mxu1 %vm284_vm2, %v279_v47  ;;  %v342_v48 = vsel %vm341_vm1, %v336_v45, %v338_v36  ;;  %v540_v55 = vpop.permute.xlu2 %539  ;;  %v225_v36 = vadd.s32 128, %v224_v33 }
  0xc0   : > { %1681 = vmatpush.msk.msra.mxu2 %vm284_vm2, %v342_v48  ;;  %1678 = vmatmul.msk.f32.vlgmr.msra.gmra.mxu0 %vm280_vm3, %v262_v44  ;;  %vm2244_vm11 = vcmp.ne.s32.totalorder %v230_v41, 0  ;;  %vm2252_vm13 = vcmp.ne.s32.totalorder %v230_v41, 15 }
  0xc1   : > { %1682 = vmatmul.msk.f32.vlgmr.msra.gmra.mxu2 %vm280_vm3, %v260_v38  ;;  %1680 = vmatmul.msk.f32.vlgmr.msra.gmra.mxu1 %vm280_vm3, %v262_v44 }
  0xc2   : > { %1689 = vmatpush.msk.msrb.mxu2 %vm284_vm2, %v2168_v15 }
  0xc6   : > { %v406_v50 = vpop.permute.xlu1 %405  ;;  %v404_v51 = vpop.permute.xlu0 %403 }
  0xc7   : > { %v410_v53 = vsel %vm409_vm5, %v404_v51, %v406_v50  ;;  %v411_v54 = vsel %vm409_vm5, %v406_v50, %v408_v49  ;;  %v608_v56 = vpop.permute.xlu2 %607 }
  0xc8   : > { %1685 = vmatpush.msk.msrb.mxu0 %vm284_vm2, %v410_v53  ;;  %1687 = vmatpush.msk.msrb.mxu1 %vm284_vm2, %v411_v54 }
  0xc9   : > { %1690 = vmatmul.msk.f32.vlgmr.msrb.gmra.mxu2 %vm280_vm3, %v475_v42  ;;  %1686 = vmatmul.msk.f32.vlgmr.msrb.gmra.mxu0 %vm280_vm3, %v394_v52  ;;  %v237_v42 = vand.u32 15, %v225_v36 }
  0xca   : > { %1688 = vmatmul.msk.f32.vlgmr.msrb.gmra.mxu1 %vm280_vm3, %v394_v52 }
  0xcb   : > { %vm2248_vm12 = vcmp.ne.s32.totalorder %v237_v42, 0  ;;  %vm2256_vm14 = vcmp.ne.s32.totalorder %v237_v42, 15 }
  0xcf   : > { %v684_v4 = vpop.permute.xlu2 %683 }
  0xd6   : > { %v538_v57 = vpop.permute.xlu1 %537  ;;  %v536_v58 = vpop.permute.xlu0 %535 }
  0xd7   : > { %v543_v60 = vsel %vm541_vm6, %v538_v57, %v540_v55  ;;  %v542_v61 = vsel %vm541_vm6, %v536_v58, %v538_v57  ;;  %v748_v10 = vpop.permute.xlu2 %747 }
  0xd8   : > { %1693 = vmatpush.msk.msra.mxu0 %vm284_vm2, %v542_v61  ;;  %1695 = vmatpush.msk.msra.mxu1 %vm284_vm2, %v543_v60 }
  0xd9   : > { %1694 = vmatmul.msk.f32.vlgmr.msra.gmra.mxu0 %vm280_vm3, %v472_v59  ;;  %1696 = vmatmul.msk.f32.vlgmr.msra.gmra.mxu1 %vm280_vm3, %v472_v59 }
  0xde   : > { %v606_v62 = vpop.permute.xlu1 %605  ;;  %v604_v63 = vpop.permute.xlu0 %603 }
  0xdf   : > { %v611_v2 = vsel %vm609_vm7, %v606_v62, %v608_v56  ;;  %v610_v3 = vsel %vm609_vm7, %v604_v63, %v606_v62  ;;  %v816_v16 = vpop.permute.xlu2 %815 }
  0xe0   : > { %1697 = vmatpush.msk.msra.mxu2 %vm284_vm2, %v610_v3  ;;  %1699 = vmatpush.msk.msra.mxu3 %vm284_vm2, %v611_v2 }
  0xe1   : > { %1698 = vmatmul.msk.f32.vlgmr.msra.gmra.mxu2 %vm280_vm3, %v594_v0  ;;  %1700 = vmatmul.msk.f32.vlgmr.msra.gmra.mxu3 %vm280_vm3, %v594_v0 }
  0xe6   : > { %v682_v5 = vpop.permute.xlu1 %681  ;;  %v680_v6 = vpop.permute.xlu0 %679 }
  0xe7   : > { %v687_v8 = vsel %vm685_vm8, %v682_v5, %v684_v4  ;;  %v686_v9 = vsel %vm685_vm8, %v680_v6, %v682_v5 }
  0xe8   : > { %1701 = vmatpush.msk.msrb.mxu0 %vm284_vm2, %v686_v9  ;;  %1703 = vmatpush.msk.msrb.mxu1 %vm284_vm2, %v687_v8  ;;  %v2016_v9 = vmov 256.0  }
  0xe9   : > { %1702 = vmatmul.msk.f32.vlgmr.msrb.gmra.mxu0 %vm280_vm3, %v670_v7  ;;  %1704 = vmatmul.msk.f32.vlgmr.msrb.gmra.mxu1 %vm280_vm3, %v670_v7  ;;  %1835 = vrcp.f32 %v2016_v9 }
  0xee   : > { %v746_v11 = vpop.permute.xlu1 %745  ;;  %v744_v12 = vpop.permute.xlu0 %743 }
  0xef   : > { %v751_v14 = vsel %vm2422_vm9, %v746_v11, %v748_v10  ;;  %v750_v15 = vsel %vm2422_vm9, %v744_v12, %v746_v11  ;;  %v1836_v10 = vpop.eup %1835 }
  0xf0   : > { %1705 = vmatpush.msk.msrb.mxu2 %vm284_vm2, %v750_v15  ;;  %1707 = vmatpush.msk.msrb.mxu3 %vm284_vm2, %v751_v14  ;;  %v883_v11 = vmul.f32 256.0, %v1836_v10  ;;  %vm887_vm15 = vweird.f32 %v1836_v10 }
  0xf1   : > { %1706 = vmatmul.msk.f32.vlgmr.msrb.gmra.mxu2 %vm280_vm3, %v666_v13  ;;  %1708 = vmatmul.msk.f32.vlgmr.msrb.gmra.mxu3 %vm280_vm3, %v666_v13 }
  0xf2   : > { %v884_v12 = vsub.f32 1.0, %v883_v11 }
  0xf4   : > { %v885_v13 = vmul.f32 %v1836_v10, %v884_v12 }
  0xf6   : > { %v814_v17 = vpop.permute.xlu1 %813  ;;  %v812_v18 = vpop.permute.xlu0 %811  ;;  %v886_v14 = vadd.f32 %v1836_v10, %v885_v13 }
  0xf7   : > { %v819_v20 = vsel %vm817_vm10, %v814_v17, %v816_v16  ;;  %v818_v21 = vsel %vm817_vm10, %v812_v18, %v814_v17 }
  0xf8   : > { %1709 = vmatpush.msk.msra.mxu0 %vm284_vm2, %v818_v21  ;;  %1711 = vmatpush.msk.msra.mxu1 %vm284_vm2, %v819_v20  ;;  %v2270_v15 = vsel %vm887_vm15, %v1836_v10, %v886_v14  ;;  %v1450_v10 = vld [vmem:[#allocation2 + $0xc] sm:$0xf] }
  0xf9   : > { %1710 = vmatmul.msk.f32.vlgmr.msra.gmra.mxu0 %vm280_vm3, %v802_v19  ;;  %1712 = vmatmul.msk.f32.vlgmr.msra.gmra.mxu1 %vm280_vm3, %v802_v19 }
 0x135   : > { %v388_v25 = vpop.f32.mrf.mxu3 }
 0x13d   : > { %v306_v22 = vpop.f32.mrf.mxu0  ;;  %v524_v29 = vpop.f32.mrf.mxu3 }
 0x13e   : > { %v326_v23 = vpop.f32.mrf.mxu1 }
 0x13f   : > { %v389_v40 = vadd.f32 %v388_v25, %v326_v23 }
 0x144   : > { %v368_v24 = vpop.f32.mrf.mxu2 }
 0x145   : > { %v369_v39 = vadd.f32 %v368_v24, %v306_v22 }
 0x146   : > { %v436_v26 = vpop.f32.mrf.mxu0 }
 0x147   : > { %v456_v27 = vpop.f32.mrf.mxu1  ;;  %v459_v45 = vadd.f32 %v436_v26, %v369_v39 }
 0x148   : > { %v460_v46 = vadd.f32 %v456_v27, %v389_v40 }
 0x149   : > { %v465_v59 = vsel %vm2244_vm11, %v459_v45, 0.0 }
 0x14a   : > { %v466_v60 = vsel %vm2248_vm12, %v460_v46, 0.0  ;;  %v1051_v46 = vld [vmem:[#allocation2 + $0xc] sm:$0xf] }
 0x14c   : > { %v504_v28 = vpop.f32.mrf.mxu2 }
 0x156   : > { %v568_v31 = vpop.f32.mrf.mxu0  ;;  %v588_v32 = vpop.f32.mrf.mxu1 }
 0x157   : > { %v569_v43 = vadd.f32 %v568_v31, %v504_v28  ;;  %v589_v44 = vadd.f32 %v588_v32, %v524_v29 }
 0x164   : > { %v636_v34 = vpop.f32.mrf.mxu2  ;;  %v656_v35 = vpop.f32.mrf.mxu3 }
 0x165   : > { %v659_v49 = vadd.f32 %v636_v34, %v569_v43  ;;  %v660_v50 = vadd.f32 %v656_v35, %v589_v44 }
 0x166   : > { %v712_v37 = vpop.f32.mrf.mxu0  ;;  %v732_v38 = vpop.f32.mrf.mxu1 }
 0x167   : > { %v661_v63 = vadd.f32 %v659_v49, %v465_v59  ;;  %v662_v0 = vadd.f32 %v660_v50, %v466_v60 }
 0x174   : > { %v776_v51 = vpop.f32.mrf.mxu2  ;;  %v796_v52 = vpop.f32.mrf.mxu3 }
 0x175   : > { %v777_v53 = vadd.f32 %v776_v51, %v712_v37  ;;  %v797_v54 = vadd.f32 %v796_v52, %v732_v38 }
 0x176   : > { %v844_v56 = vpop.f32.mrf.mxu0  ;;  %v864_v58 = vpop.f32.mrf.mxu1 }
 0x177   : > { %v867_v61 = vadd.f32 %v844_v56, %v777_v53  ;;  %v868_v62 = vadd.f32 %v864_v58, %v797_v54  ;;  %v1245_v58 = vld [vmem:[#allocation2 + $0xc] sm:$0xf] }
 0x179   : > { %v873_v2 = vsel %vm2252_vm13, %v867_v61, 0.0  ;;  %v874_v3 = vsel %vm2256_vm14, %v868_v62, 0.0  ;;  %v1320_v62 = vld [vmem:[#allocation2 + $0xc] sm:$0xf] }
 0x17a   : > { %v875_v4 = vadd.f32 %v873_v2, %v661_v63  ;;  %v876_v5 = vadd.f32 %v874_v3, %v662_v0 }
 0x17c   : > { %v877_v6 = vsel %vm284_vm2, %v875_v4, 0.0  ;;  %v878_v7 = vsel %vm284_vm2, %v876_v5, 0.0 }
 0x17d   : > { %v879_v8 = vadd.f32 %v878_v7, %v877_v6 }
 0x17f   : > { %880 = vadd.xlane.f32.xlu0 %v879_v8 }
 0x1f2   : > { %v881_v16 = vpop.xlane.xlu0 %880 }
 0x1f3   : > { %v889_v17 = vmul.f32 %v2270_v15, %v881_v16 }
 0x1f5   : > { %v890_v18 = vsub.f32 %v875_v4, %v889_v17  ;;  %v891_v19 = vsub.f32 %v876_v5, %v889_v17 }
 0x1f7   : > { %v892_v20 = vmul.f32 %v890_v18, %v890_v18  ;;  %v893_v21 = vmul.f32 %v891_v19, %v891_v19 }
 0x1f9   : > { %v894_v22 = vsel %vm284_vm2, %v892_v20, 0.0  ;;  %v895_v23 = vsel %vm284_vm2, %v893_v21, 0.0 }
 0x1fa   : > { %v896_v24 = vadd.f32 %v895_v23, %v894_v22  ;;  %v925_v22 = vld [vmem:[#allocation8 + $0xc] sm:$0xf] }
 0x1fc   : > { %897 = vadd.xlane.f32.xlu1 %v896_v24 }
 0x26f   : > { %v898_v25 = vpop.xlane.xlu1 %897 }
 0x270   : > { %v899_v26 = vmul.f32 %v898_v25, %v2270_v15 }
 0x272   : > { %v900_v27 = vadd.f32 1e-05, %v899_v26 }
 0x274   : > { %1837 = vrsqrt.f32 %v900_v27  ;;  %vm907_vm15 = vweird.f32 %v900_v27 }
 0x27a   : > { %v1838_v28 = vpop.eup %1837 }
 0x27b   : > { %v902_v29 = vmul.f32 %v1838_v28, %v900_v27  ;;  %vm908_vm0 = vweird.f32 %v1838_v28 }
 0x27c   : > { %vm909_vm9 = vmor %vm907_vm15, %vm908_vm0 }
 0x27d   : > { %v903_v30 = vmul.f32 %v1838_v28, %v902_v29 }
 0x27f   : > { %v904_v31 = vmul.f32 0.5, %v903_v30 }
 0x281   : > { %v905_v32 = vsub.f32 1.5, %v904_v31  ;;  %v1053_v31 = vld [vmem:[#allocation8 + $0x18] sm:$0xf] }
 0x283   : > { %v906_v33 = vmul.f32 %v1838_v28, %v905_v32 }
 0x285   : > { %v910_v34 = vsel %vm909_vm9, %v1838_v28, %v906_v33  ;;  %v923_v28 = vld [vmem:[#allocation8] sm:$0xf]  ;;  %v1129_v33 = vld [vmem:[#allocation8 + $0x10] sm:$0xf] }
 0x286   : > { %v911_v35 = vmul.f32 %v910_v34, %v890_v18  ;;  %v912_v36 = vmul.f32 %v910_v34, %v891_v19 }
 0x288   : > { %v914_v37 = vmax.f32 %v912_v36, 0.0  ;;  %v913_v38 = vmax.f32 %v911_v35, 0.0 }
 0x28a   : > { %v917_v39 = vrot.slane %v914_v37, 4 }
 0x28c   : > { %v2277_v40 = vsel %vm284_vm2, %v913_v38, %v917_v39  ;;  %v1126_v38 = vld [vmem:[#allocation8 + $0x4] sm:$0xf] }
 0x28d   : > { %920 = vst [vmem:[#allocation2 + $0x4] sm:$0xff] %v2277_v40 }
 0x294   : > { %v921_v41 = vld [vmem:[#allocation2] sm:$0xff]  ;;  %v922_v42 = vld [vmem:[#allocation2 + $0x8] sm:$0xf] }
 0x295   : > { %928 = vst [vmem:[#allocation1] ss:$2 sm:$0xff] %v921_v41  ;;  %v1124_v52 = vld [vmem:[#allocation2 + $0x8] sm:$0xf] }
 0x296   : > { %930 = vst [vmem:[#allocation1 + $0x10] ss:$2 sm:$0xff] %v922_v42  ;;  %v1316_v3 = vld [vmem:[#allocation2 + $0x8] sm:$0xf] }
 0x29c   : > { %v931_v43 = vld.sshfl [vmem:[#allocation1] sm:$0xff pattern:$0x75316420]  ;;  %v932_v44 = vld.sshfl [vmem:[#allocation1 + $0x8] sm:$0xff pattern:$0x75316420] }
 0x29d   : > { %934 = vrot.lane.b32.xlu2 %v931_v43, %s2008_s20  ;;  %989 = vst [vmem:[#allocation1] ss:$2 sm:$0xff] %v921_v41  ;;  %v933_v45 = vld.sshfl [vmem:[#allocation1 + $0x10] sm:$0xff pattern:$0x75316420] }
 0x29e   : > { %991 = vst [vmem:[#allocation1 + $0x10] ss:$2 sm:$0xff] %v922_v42 }
 0x2a4   : > { %v993_v49 = vld.sshfl [vmem:[#allocation1 + $0x8] sm:$0xff pattern:$0x75316420]  ;;  %v992_v50 = vld.sshfl [vmem:[#allocation1] sm:$0xff pattern:$0x75316420] }
 0x2a5   : > { %936 = vrot.lane.b32.xlu2 %v932_v44, %s2008_s20  ;;  %997 = vrot.lane.b32.xlu1 %v993_v49, %s2009_s9  ;;  %1056 = vst [vmem:[#allocation1] ss:$2 sm:$0xff] %v2277_v40  ;;  %v994_v51 = vld.sshfl [vmem:[#allocation1 + $0x10] sm:$0xff pattern:$0x75316420] }
 0x2a6   : > { %995 = vrot.lane.b32.xlu0 %v992_v50, %s2009_s9  ;;  %1058 = vst [vmem:[#allocation1 + $0x10] ss:$2 sm:$0xff] %v1051_v46  ;;  %v1247_v44 = vld [vmem:[#allocation8 + $0x1c] sm:$0xf] }
 0x2ac   : > { %v1060_v53 = vld.sshfl [vmem:[#allocation1 + $0x8] sm:$0xff pattern:$0x75316420]  ;;  %v1059_v54 = vld.sshfl [vmem:[#allocation1] sm:$0xff pattern:$0x75316420] }
 0x2ad   : > { %938 = vrot.lane.b32.xlu2 %v933_v45, %s2008_s20  ;;  %1131 = vst [vmem:[#allocation1] ss:$2 sm:$0xff] %v2277_v40  ;;  %v1061_v56 = vld.sshfl [vmem:[#allocation1 + $0x10] sm:$0xff pattern:$0x75316420]  ;;  %s1947_s20 = scalar_lea.hbm %s1946_s23, 8 }
 0x2ae   : > { %1185 = vst [vmem:[#allocation1 + $0x10] ss:$2 sm:$0xff] %v1124_v52  ;;  %v1322_v52 = vld [vmem:[#allocation8 + $0x14] sm:$0xf]  ;;  %p1948_p1 = scmp.ne.s32.totalorder %s1946_s23, %s1947_s20  ;;  %p1953_p7 = scmp.lt.s32.totalorder %s1951_s21, %s1947_s20 }
 0x2b0   : > { %p1949_p3 = pnand %p1948_p1, %p2106_p4  ;;  %p1954_p8 = por %p1953_p7, %p1952_p12 }
 0x2b2   : > { %p1950_p5 = pneg %p1949_p3 }
 0x2b4   : > { %v2287_v59 = vld.sshfl [vmem:[#allocation1] sm:$0xff pattern:$0x75316420]  ;;  %v2289_v60 = vld.sshfl [vmem:[#allocation1 + $0x8] sm:$0xff pattern:$0x75316420]  ;;  %p1955_p9 = pnand %p1954_p8, %p1950_p5 }
 0x2b5   : > { %999 = vrot.lane.b32.xlu2 %v994_v51, %s2009_s9  ;;  %1183 = vst [vmem:[#allocation1] ss:$2 sm:$0xff] %v921_v41  ;;  %v1188_v61 = vld.sshfl [vmem:[#allocation1 + $0x10] sm:$0xff pattern:$0x75316420] }
 0x2b6   : > { %1252 = vst [vmem:[#allocation1 + $0x10] ss:$2 sm:$0xff] %v1245_v58 }
 0x2bc   : > { %v1187_v63 = vld.sshfl [vmem:[#allocation1 + $0x8] sm:$0xff pattern:$0x75316420]  ;;  %v1186_v0 = vld.sshfl [vmem:[#allocation1] sm:$0xff pattern:$0x75316420] }
 0x2bd   : > { %1062 = vrot.lane.b32.xlu2 %v1059_v54, %s2010_s24  ;;  %1191 = vrot.lane.b32.xlu0 %v1187_v63, %s2011_s25  ;;  %1250 = vst [vmem:[#allocation1] ss:$2 sm:$0xff] %v2277_v40  ;;  %v1255_v2 = vld.sshfl [vmem:[#allocation1 + $0x10] sm:$0xff pattern:$0x75316420] }
 0x2be   : > { %1327 = vst [vmem:[#allocation1 + $0x10] ss:$2 sm:$0xff] %v1320_v62 }
 0x2c4   : > { %v1254_v4 = vld.sshfl [vmem:[#allocation1 + $0x8] sm:$0xff pattern:$0x75316420]  ;;  %v1253_v5 = vld.sshfl [vmem:[#allocation1] sm:$0xff pattern:$0x75316420] }
 0x2c5   : > { %1064 = vrot.lane.b32.xlu2 %v1060_v53, %s2010_s24  ;;  %1258 = vrot.lane.b32.xlu0 %v1254_v4, %s2012_s26  ;;  %1325 = vst [vmem:[#allocation1] ss:$2 sm:$0xff] %v2277_v40  ;;  %v1330_v6 = vld.sshfl [vmem:[#allocation1 + $0x10] sm:$0xff pattern:$0x75316420] }
 0x2c6   : > { %1256 = vrot.lane.b32.xlu1 %v1253_v5, %s2012_s26  ;;  %1390 = vst [vmem:[#allocation1 + $0x10] ss:$2 sm:$0xff] %v1316_v3  ;;  %v1318_v3 = vld [vmem:[#allocation8 + $0x8] sm:$0xf] }
 0x2cc   : > { %v1329_v7 = vld.sshfl [vmem:[#allocation1 + $0x8] sm:$0xff pattern:$0x75316420]  ;;  %v1328_v8 = vld.sshfl [vmem:[#allocation1] sm:$0xff pattern:$0x75316420] }
 0x2cd   : > { %1066 = vrot.lane.b32.xlu2 %v1061_v56, %s2010_s24  ;;  %1333 = vrot.lane.b32.xlu0 %v1329_v7, %s2013_s27  ;;  %1388 = vst [vmem:[#allocation1] ss:$2 sm:$0xff] %v921_v41  ;;  %v1393_v9 = vld.sshfl [vmem:[#allocation1 + $0x10] sm:$0xff pattern:$0x75316420] }
 0x2ce   : > { %1331 = vrot.lane.b32.xlu1 %v1328_v8, %s2013_s27  ;;  %1457 = vst [vmem:[#allocation1 + $0x10] ss:$2 sm:$0xff] %v1450_v10 }
 0x2d4   : > { %v1391_v11 = vld.sshfl [vmem:[#allocation1] sm:$0xff pattern:$0x75316420]  ;;  %v1392_v12 = vld.sshfl [vmem:[#allocation1 + $0x8] sm:$0xff pattern:$0x75316420] }
 0x2d5   : > { %1193 = vrot.lane.b32.xlu2 %v1188_v61, %s2011_s25  ;;  %1455 = vst [vmem:[#allocation1] ss:$2 sm:$0xff] %v2277_v40  ;;  %v1460_v16 = vld.sshfl [vmem:[#allocation1 + $0x10] sm:$0xff pattern:$0x75316420] }
 0x2dc   : > { %v1459_v13 = vld.sshfl [vmem:[#allocation1 + $0x8] sm:$0xff pattern:$0x75316420]  ;;  %v1458_v14 = vld.sshfl [vmem:[#allocation1] sm:$0xff pattern:$0x75316420] }
 0x2dd   : > { %1189 = vrot.lane.b32.xlu2 %v1186_v0, %s2011_s25  ;;  %1463 = vrot.lane.b32.xlu0 %v1459_v13, %s2015_s29 }
 0x2de   : > { %1461 = vrot.lane.b32.xlu1 %v1458_v14, %s2015_s29 }
 0x2e5   : > { %1260 = vrot.lane.b32.xlu2 %v1255_v2, %s2012_s26  ;;  %1396 = vrot.lane.b32.xlu0 %v1392_v12, %s2014_s28 }
 0x2e6   : > { %1394 = vrot.lane.b32.xlu1 %v1391_v11, %s2014_s28 }
 0x2ed   : > { %1335 = vrot.lane.b32.xlu2 %v1330_v6, %s2013_s27 }
 0x2f5   : > { %1465 = vrot.lane.b32.xlu2 %v1460_v16, %s2015_s29 }
 0x2f7   : > { %v935_v17 = vpop.permute.xlu2 %934 }
 0x2fd   : > { %1398 = vrot.lane.b32.xlu2 %v1393_v9, %s2014_s28 }
 0x2ff   : > { %v937_v18 = vpop.permute.xlu2 %936 }
 0x300   : > { %v940_v19 = vsel %vm277_vm4, %v935_v17, %v937_v18 }
 0x301   : > { %1713 = vmatpush.msk.msra.mxu2 %vm284_vm2, %v940_v19 }
 0x302   : > { %1714 = vmatmul.msk.f32.vlgmr.msra.gmra.mxu2 %vm280_vm3, %v925_v22 }
 0x307   : > { %v939_v20 = vpop.permute.xlu2 %938 }
 0x308   : > { %v941_v21 = vsel %vm277_vm4, %v937_v18, %v939_v20 }
 0x309   : > { %1715 = vmatpush.msk.msra.mxu3 %vm284_vm2, %v941_v21 }
 0x30a   : > { %1716 = vmatmul.msk.f32.vlgmr.msra.gmra.mxu3 %vm280_vm3, %v925_v22 }
 0x30f   : > { %v1000_v23 = vpop.permute.xlu2 %999 }
 0x317   : > { %v998_v24 = vpop.permute.xlu1 %997  ;;  %v1063_v25 = vpop.permute.xlu2 %1062 }
 0x318   : > { %v1002_v26 = vsel %vm341_vm1, %v998_v24, %v1000_v23  ;;  %v996_v27 = vpop.permute.xlu0 %995 }
 0x319   : > { %v1001_v29 = vsel %vm341_vm1, %v996_v27, %v998_v24  ;;  %1719 = vmatpush.msk.msrb.mxu1 %vm284_vm2, %v1002_v26  ;;  %vm2437_vm1 = vcmask 121856  }
 0x31a   : > { %1717 = vmatpush.msk.msrb.mxu0 %vm284_vm2, %v1001_v29  ;;  %1720 = vmatmul.msk.f32.vlgmr.msrb.gmra.mxu1 %vm280_vm3, %v923_v28  ;;  %vm2438_vm4 = vmmov %vm2437_vm1 }
 0x31b   : > { %1727 = vmatpush.msk.msra.mxu1 %vm284_vm2, %v2289_v60  ;;  %1718 = vmatmul.msk.f32.vlgmr.msrb.gmra.mxu0 %vm280_vm3, %v923_v28  ;;  %v1452_v60 = vld [vmem:[#allocation8 + $0x20] sm:$0xf] }
 0x31c   : > { %1725 = vmatpush.msk.msra.mxu0 %vm284_vm2, %v2287_v59 }
 0x31f   : > { %v1065_v30 = vpop.permute.xlu2 %1064 }
 0x320   : > { %v1068_v32 = vsel %vm409_vm5, %v1063_v25, %v1065_v30 }
 0x321   : > { %1721 = vmatpush.msk.msrb.mxu2 %vm284_vm2, %v1068_v32 }
 0x322   : > { %1722 = vmatmul.msk.f32.vlgmr.msrb.gmra.mxu2 %vm280_vm3, %v1053_v31  ;;  %1728 = vmatmul.msk.f32.vlgmr.msra.gmra.mxu1 %vm280_vm3, %v1129_v33 }
 0x323   : > { %1726 = vmatmul.msk.f32.vlgmr.msra.gmra.mxu0 %vm280_vm3, %v1129_v33 }
 0x327   : > { %v1067_v34 = vpop.permute.xlu2 %1066 }
 0x328   : > { %v1069_v35 = vsel %vm409_vm5, %v1065_v30, %v1067_v34 }
 0x329   : > { %1723 = vmatpush.msk.msrb.mxu3 %vm284_vm2, %v1069_v35 }
 0x32a   : > { %1724 = vmatmul.msk.f32.vlgmr.msrb.gmra.mxu3 %vm280_vm3, %v1053_v31 }
 0x32f   : > { %v1194_v36 = vpop.permute.xlu2 %1193  ;;  %v1192_v37 = vpop.permute.xlu0 %1191 }
 0x330   : > { %v1196_v39 = vsel %vm541_vm6, %v1192_v37, %v1194_v36 }
 0x331   : > { %1731 = vmatpush.msk.msra.mxu3 %vm284_vm2, %v1196_v39 }
 0x332   : > { %1732 = vmatmul.msk.f32.vlgmr.msra.gmra.mxu3 %vm280_vm3, %v1126_v38 }
 0x337   : > { %v1190_v40 = vpop.permute.xlu2 %1189  ;;  %v1259_v41 = vpop.permute.xlu0 %1258 }
 0x338   : > { %v1195_v42 = vsel %vm541_vm6, %v1190_v40, %v1192_v37  ;;  %v1257_v43 = vpop.permute.xlu1 %1256 }
 0x339   : > { %v1262_v45 = vsel %vm609_vm7, %v1257_v43, %v1259_v41  ;;  %1729 = vmatpush.msk.msra.mxu2 %vm284_vm2, %v1195_v42 }
 0x33a   : > { %1733 = vmatpush.msk.msrb.mxu0 %vm284_vm2, %v1262_v45  ;;  %1730 = vmatmul.msk.f32.vlgmr.msra.gmra.mxu2 %vm280_vm3, %v1126_v38 }
 0x33b   : > { %1734 = vmatmul.msk.f32.vlgmr.msrb.gmra.mxu0 %vm280_vm3, %v1247_v44 }
 0x33f   : > { %v1261_v46 = vpop.permute.xlu2 %1260  ;;  %v1334_v49 = vpop.permute.xlu0 %1333 }
 0x340   : > { %v1263_v50 = vsel %vm609_vm7, %v1259_v41, %v1261_v46  ;;  %v1332_v51 = vpop.permute.xlu1 %1331 }
 0x341   : > { %v1337_v53 = vsel %vm685_vm8, %v1332_v51, %v1334_v49  ;;  %1735 = vmatpush.msk.msrb.mxu1 %vm284_vm2, %v1263_v50 }
 0x342   : > { %1737 = vmatpush.msk.msrb.mxu2 %vm284_vm2, %v1337_v53  ;;  %1736 = vmatmul.msk.f32.vlgmr.msrb.gmra.mxu1 %vm280_vm3, %v1247_v44 }
 0x343   : > { %1738 = vmatmul.msk.f32.vlgmr.msrb.gmra.mxu2 %vm280_vm3, %v1322_v52 }
 0x347   : > { %v1336_v54 = vpop.permute.xlu2 %1335 }
 0x348   : > { %v1338_v56 = vsel %vm685_vm8, %v1334_v49, %v1336_v54 }
 0x349   : > { %1739 = vmatpush.msk.msrb.mxu3 %vm284_vm2, %v1338_v56 }
 0x34a   : > { %1740 = vmatmul.msk.f32.vlgmr.msrb.gmra.mxu3 %vm280_vm3, %v1322_v52 }
 0x34f   : > { %v1466_v58 = vpop.permute.xlu2 %1465  ;;  %v1464_v59 = vpop.permute.xlu0 %1463 }
 0x350   : > { %v1468_v61 = vsel %vm817_vm10, %v1464_v59, %v1466_v58  ;;  %v1462_v62 = vpop.permute.xlu1 %1461 }
 0x351   : > { %v1467_v63 = vsel %vm817_vm10, %v1462_v62, %v1464_v59  ;;  %1747 = vmatpush.msk.msra.mxu3 %vm284_vm2, %v1468_v61 }
 0x352   : > { %1745 = vmatpush.msk.msra.mxu2 %vm284_vm2, %v1467_v63  ;;  %1748 = vmatmul.msk.f32.vlgmr.msra.gmra.mxu3 %vm280_vm3, %v1452_v60 }
 0x353   : > { %1746 = vmatmul.msk.f32.vlgmr.msra.gmra.mxu2 %vm280_vm3, %v1452_v60 }
 0x357   : > { %v1399_v0 = vpop.permute.xlu2 %1398  ;;  %v1397_v2 = vpop.permute.xlu0 %1396 }
 0x358   : > { %v1401_v4 = vsel %vm2437_vm1, %v1397_v2, %v1399_v0  ;;  %v1395_v5 = vpop.permute.xlu1 %1394 }
 0x359   : > { %v1400_v6 = vsel %vm2438_vm4, %v1395_v5, %v1397_v2  ;;  %1743 = vmatpush.msk.msra.mxu1 %vm284_vm2, %v1401_v4 }
 0x35a   : > { %1741 = vmatpush.msk.msra.mxu0 %vm284_vm2, %v1400_v6  ;;  %1744 = vmatmul.msk.f32.vlgmr.msra.gmra.mxu1 %vm280_vm3, %v1318_v3 }
 0x35b   : > { %1742 = vmatmul.msk.f32.vlgmr.msra.gmra.mxu0 %vm280_vm3, %v1318_v3 }
 0x385   : > { %v966_v8 = vpop.f32.mrf.mxu2 }
 0x38d   : > { %v986_v7 = vpop.f32.mrf.mxu3 }
 0x397   : > { %v1047_v9 = vpop.f32.mrf.mxu1 }
 0x398   : > { %v1027_v11 = vpop.f32.mrf.mxu0  ;;  %v1048_v22 = vadd.f32 %v1047_v9, %v986_v7 }
 0x399   : > { %v1028_v23 = vadd.f32 %v1027_v11, %v966_v8 }
 0x39f   : > { %v1178_v13 = vpop.f32.mrf.mxu1 }
 0x3a0   : > { %v1158_v16 = vpop.f32.mrf.mxu0 }
 0x3a5   : > { %v1094_v12 = vpop.f32.mrf.mxu2 }
 0x3a6   : > { %v1117_v27 = vadd.f32 %v1094_v12, %v1028_v23 }
 0x3a8   : > { %v1119_v38 = vsel %vm2244_vm11, %v1117_v27, 0.0 }
 0x3ad   : > { %v1114_v10 = vpop.f32.mrf.mxu3 }
 0x3ae   : > { %v1118_v26 = vadd.f32 %v1114_v10, %v1048_v22 }
 0x3b0   : > { %v1120_v36 = vsel %vm2248_vm12, %v1118_v26, 0.0 }
 0x3b5   : > { %v1241_v14 = vpop.f32.mrf.mxu3 }
 0x3b6   : > { %v1242_v24 = vadd.f32 %v1241_v14, %v1178_v13 }
 0x3b8   : > { %v1288_v21 = vpop.f32.mrf.mxu0 }
 0x3bd   : > { %v1221_v17 = vpop.f32.mrf.mxu2 }
 0x3be   : > { %v1222_v25 = vadd.f32 %v1221_v17, %v1158_v16 }
 0x3bf   : > { %v1308_v20 = vpop.f32.mrf.mxu1 }
 0x3c0   : > { %v1312_v28 = vadd.f32 %v1308_v20, %v1242_v24  ;;  %v1311_v31 = vadd.f32 %v1288_v21, %v1222_v25 }
 0x3c2   : > { %v1314_v39 = vadd.f32 %v1312_v28, %v1120_v36  ;;  %v1313_v41 = vadd.f32 %v1311_v31, %v1119_v38 }
 0x3c6   : > { %v1363_v19 = vpop.f32.mrf.mxu2 }
 0x3cd   : > { %v1383_v18 = vpop.f32.mrf.mxu3 }
 0x3d5   : > { %v1513_v30 = vpop.f32.mrf.mxu3 }
 0x3d6   : > { %v1493_v34 = vpop.f32.mrf.mxu2 }
 0x3d7   : > { %v1446_v29 = vpop.f32.mrf.mxu1 }
 0x3d8   : > { %v1426_v32 = vpop.f32.mrf.mxu0  ;;  %v1447_v33 = vadd.f32 %v1446_v29, %v1383_v18 }
 0x3d9   : > { %v1427_v35 = vadd.f32 %v1426_v32, %v1363_v19 }
 0x3da   : > { %v1517_v37 = vadd.f32 %v1513_v30, %v1447_v33 }
 0x3db   : > { %v1516_v40 = vadd.f32 %v1493_v34, %v1427_v35 }
 0x3dc   : > { %v1519_v42 = vsel %vm2256_vm14, %v1517_v37, 0.0 }
 0x3dd   : > { %v1518_v43 = vsel %vm2252_vm13, %v1516_v40, 0.0  ;;  %v1521_v44 = vadd.f32 %v1519_v42, %v1314_v39 }
 0x3de   : > { %v1520_v45 = vadd.f32 %v1518_v43, %v1313_v41 }
 0x3df   : > { %v1523_v46 = vsel %vm284_vm2, %v1521_v44, 0.0 }
 0x3e0   : > { %v1522_v48 = vsel %vm284_vm2, %v1520_v45, 0.0 }
 0x3e1   : > { %v1524_v49 = vadd.f32 %v1523_v46, %v1522_v48 }
 0x3e3   : > { %1525 = vadd.xlane.f32.xlu1 %v1524_v49 }
 0x456   : > { %v1526_v50 = vpop.xlane.xlu1 %1525 }
 0x457   : > { %v1527_v47 = vmul.f32 %v1526_v50, %v2270_v15 }
 0x459   : > { %v1528_v51 = vsub.f32 %v1520_v45, %v1527_v47  ;;  %v1529_v52 = vsub.f32 %v1521_v44, %v1527_v47 }
 0x45b   : > { %v1530_v53 = vmul.f32 %v1528_v51, %v1528_v51  ;;  %v1531_v57 = vmul.f32 %v1529_v52, %v1529_v52 }
 0x45d   : > { %v1532_v54 = vsel %vm284_vm2, %v1530_v53, 0.0  ;;  %v1533_v55 = vsel %vm284_vm2, %v1531_v57, 0.0 }
 0x45e   : > { %v1534_v56 = vadd.f32 %v1533_v55, %v1532_v54 }
 0x460   : > { %1535 = vadd.xlane.f32.xlu0 %v1534_v56 }
 0x4d3   : > { %v1536_v58 = vpop.xlane.xlu0 %1535 }
 0x4d4   : > { %v1537_v59 = vmul.f32 %v1536_v58, %v2270_v15 }
 0x4d6   : > { %v1538_v60 = vadd.f32 1e-05, %v1537_v59 }
 0x4d8   : > { %1839 = vrsqrt.f32 %v1538_v60  ;;  %vm1545_vm5 = vweird.f32 %v1538_v60 }
 0x4de   : > { %v1840_v61 = vpop.eup %1839 }
 0x4df   : > { %v1540_v62 = vmul.f32 %v1840_v61, %v1538_v60  ;;  %vm1546_vm3 = vweird.f32 %v1840_v61 }
 0x4e0   : > { %vm1547_vm6 = vmor %vm1545_vm5, %vm1546_vm3 }
 0x4e1   : > { %v1541_v63 = vmul.f32 %v1840_v61, %v1540_v62 }
 0x4e3   : > { %v1542_v0 = vmul.f32 0.5, %v1541_v63 }
 0x4e5   : > { %v1543_v2 = vsub.f32 1.5, %v1542_v0 }
 0x4e7   : > { %v1544_v3 = vmul.f32 %v1840_v61, %v1543_v2 }
 0x4e9   : > { %v1548_v4 = vsel %vm1547_vm6, %v1840_v61, %v1544_v3 }
 0x4ea   : > { %v1550_v15 = vmul.f32 %v1548_v4, %v1529_v52  ;;  %v1549_v5 = vmul.f32 %v1548_v4, %v1528_v51 }
 0x4ec   : > { %v1553_v6 = vrot.slane %v1550_v15, 4 }
 0x4ee   : > { %v1554_v7 = vsel %vm284_vm2, %v1549_v5, %v1553_v6 }
 0x4ef   : > { %v1556_v8 = vadd.f32 %v1554_v7, %v2151_v1 }
 0x4f1   : > { %1557 = vst [vmem:[%s221_s18] sm:$0xff] %v1556_v8 }
 0x4f2   : > { %1958 = shalt.err (!%p1955_p9)
}
 0x4f3   : > { %1766 = dma.vmem_to_hbm [thread:$0]  (%p2106_p4), %s1573_s8, 128, %s1575_s22, %s1559_s19  }
 0x4f4 PF: > { %s1586_s10 = sand.u32 1, %s1989_s12   ;;  %p2439_p10 = scmp.ge.s32.totalorder %s2001_s15, 2 }
 0x4f5   : > { %s1587_s27 = scalar_lea.sflag [#allocation5], %s1586_s10 }
 0x4f6   : > { %p1780_p13 = pnand %p2439_p10, %p2110_p6 }
 0x4f8   : > { %p1781_p11 = pneg %p1780_p13 }
 0x4fa   : > { %1984 = dma.done.wait (%p1781_p11), %s1587_s27, 128  }
 0x4fb   : > { %1986 = vsyncadd (%p1781_p11), %s1587_s27, 4294967168  ;;  %p17_p0 = scmp.ge.s32.totalorder %s2080_s4, 4   ;;  %s2440_s12 = smov %s1993_s13 }
 0x4fc   : > { %s2441_s13 = smov %s1997_s14  ;;  %s2442_s14 = smov %s2091_s7 }
 0x4fd   : > { %s2443_s15 = smov %s2080_s4  ;;  %19 = sbr.rel (!%p17_p0) target bundleno = 6 (0x6), region = 117 }
 0x502   :  { %1593 = vsyncpa [#allocation4], 1 }
 0x503   :  { %1595 = vsyncpa [#allocation4 + $0x1], 1 }
 0x504   :  { %1596 = vsyncpa [#allocation7], 1 }
 0x505   :  { %1597 = vsyncpa [#allocation5], 1 }
 0x506   :  { %1599 = vsyncpa [#allocation5 + $0x1], 1 }

</bundles_post_ra>
